<compile_context>
chip_gen: v5e
topology: v5e:2x2
jax: 0.10.0
libtpu: 0.0.40
codegen_flags: <defaults>
</compile_context>

<pallas_src>
import functools

import jax
import jax.numpy as jnp
from jax.experimental import pallas as pl
from jax.experimental.pallas import tpu as pltpu

_LANE = 128
_SUBLANE = 8
_HI = jax.lax.Precision.HIGHEST


def _round_up(n, m):
    return (n + m - 1) // m * m


def _pad2(a, rows, cols):
    return jnp.pad(a, ((0, rows - a.shape[0]), (0, cols - a.shape[1])))


def _rnn_fused_kernel(x_ref, w_cat_ref, b_cat_ref, h0_ref, w_out_ref, b_out_ref,
                      out_ref, hn_ref, cat_ref, *, num_layers, hp):
    """Single-step multi-layer tanh RNN; fc_in folded into layer 0, fc_out fused in.

    All feature dims are pre-padded to 128 lanes, batch to 8 sublanes, so every
    load/store is dense and each layer is a single (B, 2*hp) x (2*hp, hp) MXU dot.
    """
    layer_in = x_ref[...]                       # (B, hp); fc_in already folded into w_cat[0]
    for l in range(num_layers):                 # static unroll over layers (L is small)
        cat_ref[:, :hp] = layer_in              # 128-aligned lane slice: current layer input
        cat_ref[:, hp:] = h0_ref[l]             # previous hidden state for this layer
        gates = (jnp.dot(cat_ref[...], w_cat_ref[l],
                         preferred_element_type=jnp.float32, precision=_HI)
                 + b_cat_ref[l])
        h = jnp.tanh(gates)                     # EUP
        hn_ref[l] = h                           # full-lane store of the new hidden state
        layer_in = h

    # fc_out on the last layer's hidden state
    out_ref[...] = (jnp.dot(layer_in, w_out_ref[...],
                            preferred_element_type=jnp.float32, precision=_HI)
                    + b_out_ref[...])


def prepare_params(params, *, num_layers):
    """One-time prep: fold fc_in into layer 0, fuse ih/hh weights, zero-pad to 128 lanes."""
    D_in = params["w_in"].shape[0]
    I = params["w_ih"].shape[1]
    H = params["w_hh"].shape[-1]
    D_out = params["w_out"].shape[-1]
    HP = _round_up(max(D_in, I, H), _LANE)       # padded feature / hidden dim
    DOP = _round_up(D_out, _LANE)                # padded output dim

    # fc_in folded into layer 0:  x @ (w_in @ w_ih0) + (b_in @ w_ih0 + b_ih0)
    w0 = jnp.dot(params["w_in"], params["w_ih"][0], precision=_HI)              # (D_in, H)
    b0 = jnp.dot(params["b_in"], params["w_ih"][0], precision=_HI) + params["b_ih"][0]

    w_cat, b_cat = [], []
    for l in range(num_layers):
        w_top = w0 if l == 0 else params["w_ih"][l]
        b_top = b0 if l == 0 else params["b_ih"][l]
        w_cat.append(jnp.concatenate(
            [_pad2(w_top, HP, HP), _pad2(params["w_hh"][l], HP, HP)], axis=0))  # (2*HP, HP)
        b_cat.append(_pad2(b_top + params["b_hh"][l], 1, HP))                   # (1, HP)

    return {
        "w_cat": jnp.stack(w_cat),                    # (L, 2*HP, HP)
        "b_cat": jnp.stack(b_cat),                    # (L, 1, HP)
        "w_out": _pad2(params["w_out"], HP, DOP),     # (HP, DOP)
        "b_out": _pad2(params["b_out"], 1, DOP),      # (1, DOP)
    }


def custom_rnn_forward(x, h0, prep, *, out_size):
    """x: (B, D_in) f32, h0: (L, B, H) f32. Returns (out (B, D_out), new_hidden (L, B, H))."""
    B = x.shape[0]
    L, _, H = h0.shape
    HP = prep["w_cat"].shape[-1]
    DOP = prep["w_out"].shape[-1]
    BP = _round_up(B, _SUBLANE)                                 # sublane-dense batch

    x_p = _pad2(x, BP, HP)                                      # (BP, HP) lane/sublane-dense
    h0_p = jnp.pad(h0, ((0, 0), (0, BP - B), (0, HP - H)))      # (L, BP, HP)

    vmem = pl.BlockSpec(memory_space=pltpu.MemorySpace.VMEM)
    kernel = functools.partial(_rnn_fused_kernel, num_layers=L, hp=HP)

    out_p, hn_p = pl.pallas_call(
        kernel,
        out_shape=(
            jax.ShapeDtypeStruct((BP, DOP), jnp.float32),
            jax.ShapeDtypeStruct((L, BP, HP), jnp.float32),
        ),
        in_specs=[vmem] * 6,
        out_specs=(vmem, vmem),
        scratch_shapes=[pltpu.VMEM((BP, 2 * HP), jnp.float32)],  # concat([layer_in, h_prev])
        # hidden state buffer reused: h0_p (input 3) aliases hn (output 1).
        input_output_aliases={3: 1},
    )(x_p, prep["w_cat"], prep["b_cat"], h0_p, prep["w_out"], prep["b_out"])

    return out_p[:B, :out_size], hn_p[:, :B, :H]


def _reference_forward(x, params, *, num_layers):
    """Pure-JAX reference with the original (unfolded, unfused) PyTorch math."""
    layer_in = jnp.dot(x, params["w_in"], precision=_HI) + params["b_in"]
    hs = []
    for l in range(num_layers):
        h = jnp.tanh(jnp.dot(layer_in, params["w_ih"][l], precision=_HI) + params["b_ih"][l]
                     + jnp.dot(params["h0"][l], params["w_hh"][l], precision=_HI)
                     + params["b_hh"][l])
        hs.append(h)
        layer_in = h
    out = jnp.dot(layer_in, params["w_out"], precision=_HI) + params["b_out"]
    return out, jnp.stack(hs, axis=0)


if __name__ == "__main__":
    # Small shapes consistent with the module's constructor kwargs.
    B = 8               # batch
    D_IN = 16           # block_input_dim (fc_input_size)
    I = 32              # input_size (RNN input dim) -- equals hidden_size so layers stack
    H = 32              # hidden_size
    L = 2               # num_layers
    D_OUT = 8           # block_output_dim (fc_output_size)

    key = jax.random.PRNGKey(0)
    keys = jax.random.split(key, 9)

    params = {
        # fc_in: Linear(D_IN, I) -> stored transposed (D_IN, I)
        "w_in": jax.random.normal(keys[0], (D_IN, I), jnp.float32) * 0.1,
        "b_in": jax.random.normal(keys[1], (1, I), jnp.float32) * 0.1,
        # stacked per-layer RNN weights (transposed to (in, out))
        "w_ih": jax.random.normal(keys[2], (L, I, H), jnp.float32) * 0.1,
        "w_hh": jax.random.normal(keys[3], (L, H, H), jnp.float32) * 0.1,
        "b_ih": jax.random.normal(keys[4], (L, 1, H), jnp.float32) * 0.1,
        "b_hh": jax.random.normal(keys[5], (L, 1, H), jnp.float32) * 0.1,
        # initial hidden state: the module resets to zeros and repeats over batch
        "h0": jnp.zeros((L, B, H), jnp.float32),
        # fc_out: Linear(H, D_OUT) -> stored transposed (H, D_OUT)
        "w_out": jax.random.normal(keys[6], (H, D_OUT), jnp.float32) * 0.1,
        "b_out": jax.random.normal(keys[7], (1, D_OUT), jnp.float32) * 0.1,
    }

    x = jax.random.normal(keys[8], (B, D_IN), jnp.float32)

    # One-time parameter prep (fold/fuse/pad), then a jitted single-step forward.
    prep = prepare_params(params, num_layers=L)
    fwd = jax.jit(functools.partial(custom_rnn_forward, out_size=D_OUT))

    out, new_hidden = fwd(x, params["h0"], prep)
    out = jax.block_until_ready(out)
    new_hidden = jax.block_until_ready(new_hidden)

    # module keeps self.hidden_state = new_hidden[:, -1, :] (Python-side bookkeeping)
    _kept_hidden = new_hidden[:, -1, :]

    ref_out, ref_hidden = _reference_forward(x, params, num_layers=L)
    assert out.shape == (B, D_OUT)
    assert new_hidden.shape == (L, B, H)
    # fc_in folding / matmul fusion change f32 summation order slightly -> 1e-4 tolerance.
    assert jnp.allclose(out, ref_out, atol=1e-4, rtol=1e-4)
    assert jnp.allclose(new_hidden, ref_hidden, atol=1e-4, rtol=1e-4)

    print("KERNEL_OK")
</pallas_src>

<mosaic_0001>
module attributes {stable_mosaic.version = 11 : i64} {
  func.func @_rnn_fused_kernel(%arg0: memref<8x128xf32, #tpu.memory_space<vmem>>, %arg1: memref<2x256x128xf32, #tpu.memory_space<vmem>>, %arg2: memref<2x1x128xf32, #tpu.memory_space<vmem>>, %arg3: memref<2x8x128xf32, #tpu.memory_space<vmem>>, %arg4: memref<128x128xf32, #tpu.memory_space<vmem>>, %arg5: memref<1x128xf32, #tpu.memory_space<vmem>>, %arg6: memref<8x128xf32, #tpu.memory_space<vmem>>, %arg7: memref<2x8x128xf32, #tpu.memory_space<vmem>>, %arg8: memref<8x256xf32, #tpu.memory_space<vmem>>) attributes {dimension_semantics = [], scalar_prefetch = 0 : i64, scratch_operands = 1 : i64, tpu.core_type = #tpu.core_type<tc>} {
    %c0 = arith.constant 0 : index
    %c0_0 = arith.constant 0 : index
    %0 = vector.load %arg0[%c0, %c0_0] : memref<8x128xf32, #tpu.memory_space<vmem>>, vector<8x128xf32>
    %c0_1 = arith.constant 0 : index
    %c0_2 = arith.constant 0 : index
    %1 = vector.load %arg8[%c0_1, %c0_2] : memref<8x256xf32, #tpu.memory_space<vmem>>, vector<8x128xf32>
    tpu.vector_store %arg8[%c0_1, %c0_2], %0 {strides = array<i32>} : memref<8x256xf32, #tpu.memory_space<vmem>>, vector<8x128xf32>,
    %c0_3 = arith.constant 0 : index
    %c0_4 = arith.constant 0 : index
    %c0_5 = arith.constant 0 : index
    %2 = vector.load %arg3[%c0_3, %c0_4, %c0_5] : memref<2x8x128xf32, #tpu.memory_space<vmem>>, vector<1x8x128xf32>
    %3 = vector.shape_cast %2 : vector<1x8x128xf32> to vector<8x128xf32>
    %c0_6 = arith.constant 0 : index
    %c128 = arith.constant 128 : index
    %4 = vector.load %arg8[%c0_6, %c128] : memref<8x256xf32, #tpu.memory_space<vmem>>, vector<8x128xf32>
    tpu.vector_store %arg8[%c0_6, %c128], %3 {strides = array<i32>} : memref<8x256xf32, #tpu.memory_space<vmem>>, vector<8x128xf32>,
    %c0_7 = arith.constant 0 : index
    %c0_8 = arith.constant 0 : index
    %5 = vector.load %arg8[%c0_7, %c0_8] : memref<8x256xf32, #tpu.memory_space<vmem>>, vector<8x256xf32>
    %c0_9 = arith.constant 0 : index
    %c0_10 = arith.constant 0 : index
    %c0_11 = arith.constant 0 : index
    %6 = vector.load %arg1[%c0_9, %c0_10, %c0_11] : memref<2x256x128xf32, #tpu.memory_space<vmem>>, vector<1x256x128xf32>
    %7 = vector.shape_cast %6 : vector<1x256x128xf32> to vector<256x128xf32>
    %cst = arith.constant dense<0.000000e+00> : vector<8x128xf32>
    %8 = tpu.matmul %5, %7, %cst {dimension_numbers = #tpu.dot_dimension_numbers<[1], [0], [0], [1], [0, 0, 1, 1], [], []>, precision = #tpu.contract_precision<fp32>} : vector<8x256xf32>, vector<256x128xf32>, vector<8x128xf32> -> vector<8x128xf32>
    %c0_12 = arith.constant 0 : index
    %c0_13 = arith.constant 0 : index
    %c0_14 = arith.constant 0 : index
    %9 = vector.load %arg2[%c0_12, %c0_13, %c0_14] : memref<2x1x128xf32, #tpu.memory_space<vmem>>, vector<1x1x128xf32>
    %10 = vector.shape_cast %9 : vector<1x1x128xf32> to vector<1x128xf32>
    %11 = vector.broadcast %10 : vector<1x128xf32> to vector<8x128xf32>
    %12 = arith.addf %8, %11 : vector<8x128xf32>
    %13 = math.tanh %12 : vector<8x128xf32>
    %c0_15 = arith.constant 0 : index
    %c0_16 = arith.constant 0 : index
    %c0_17 = arith.constant 0 : index
    %14 = vector.load %arg7[%c0_15, %c0_16, %c0_17] : memref<2x8x128xf32, #tpu.memory_space<vmem>>, vector<1x8x128xf32>
    %15 = vector.shape_cast %14 : vector<1x8x128xf32> to vector<8x128xf32>
    %16 = vector.shape_cast %13 : vector<8x128xf32> to vector<1x8x128xf32>
    tpu.vector_store %arg7[%c0_15, %c0_16, %c0_17], %16 {strides = array<i32>} : memref<2x8x128xf32, #tpu.memory_space<vmem>>, vector<1x8x128xf32>,
    %c0_18 = arith.constant 0 : index
    %c0_19 = arith.constant 0 : index
    %17 = vector.load %arg8[%c0_18, %c0_19] : memref<8x256xf32, #tpu.memory_space<vmem>>, vector<8x128xf32>
    tpu.vector_store %arg8[%c0_18, %c0_19], %13 {strides = array<i32>} : memref<8x256xf32, #tpu.memory_space<vmem>>, vector<8x128xf32>,
    %c1 = arith.constant 1 : index
    %c0_20 = arith.constant 0 : index
    %c0_21 = arith.constant 0 : index
    %18 = vector.load %arg3[%c1, %c0_20, %c0_21] : memref<2x8x128xf32, #tpu.memory_space<vmem>>, vector<1x8x128xf32>
    %19 = vector.shape_cast %18 : vector<1x8x128xf32> to vector<8x128xf32>
    %c0_22 = arith.constant 0 : index
    %c128_23 = arith.constant 128 : index
    %20 = vector.load %arg8[%c0_22, %c128_23] : memref<8x256xf32, #tpu.memory_space<vmem>>, vector<8x128xf32>
    tpu.vector_store %arg8[%c0_22, %c128_23], %19 {strides = array<i32>} : memref<8x256xf32, #tpu.memory_space<vmem>>, vector<8x128xf32>,
    %c0_24 = arith.constant 0 : index
    %c0_25 = arith.constant 0 : index
    %21 = vector.load %arg8[%c0_24, %c0_25] : memref<8x256xf32, #tpu.memory_space<vmem>>, vector<8x256xf32>
    %c1_26 = arith.constant 1 : index
    %c0_27 = arith.constant 0 : index
    %c0_28 = arith.constant 0 : index
    %22 = vector.load %arg1[%c1_26, %c0_27, %c0_28] : memref<2x256x128xf32, #tpu.memory_space<vmem>>, vector<1x256x128xf32>
    %23 = vector.shape_cast %22 : vector<1x256x128xf32> to vector<256x128xf32>
    %cst_29 = arith.constant dense<0.000000e+00> : vector<8x128xf32>
    %24 = tpu.matmul %21, %23, %cst_29 {dimension_numbers = #tpu.dot_dimension_numbers<[1], [0], [0], [1], [0, 0, 1, 1], [], []>, precision = #tpu.contract_precision<fp32>} : vector<8x256xf32>, vector<256x128xf32>, vector<8x128xf32> -> vector<8x128xf32>
    %c1_30 = arith.constant 1 : index
    %c0_31 = arith.constant 0 : index
    %c0_32 = arith.constant 0 : index
    %25 = vector.load %arg2[%c1_30, %c0_31, %c0_32] : memref<2x1x128xf32, #tpu.memory_space<vmem>>, vector<1x1x128xf32>
    %26 = vector.shape_cast %25 : vector<1x1x128xf32> to vector<1x128xf32>
    %27 = vector.broadcast %26 : vector<1x128xf32> to vector<8x128xf32>
    %28 = arith.addf %24, %27 : vector<8x128xf32>
    %29 = math.tanh %28 : vector<8x128xf32>
    %c1_33 = arith.constant 1 : index
    %c0_34 = arith.constant 0 : index
    %c0_35 = arith.constant 0 : index
    %30 = vector.load %arg7[%c1_33, %c0_34, %c0_35] : memref<2x8x128xf32, #tpu.memory_space<vmem>>, vector<1x8x128xf32>
    %31 = vector.shape_cast %30 : vector<1x8x128xf32> to vector<8x128xf32>
    %32 = vector.shape_cast %29 : vector<8x128xf32> to vector<1x8x128xf32>
    tpu.vector_store %arg7[%c1_33, %c0_34, %c0_35], %32 {strides = array<i32>} : memref<2x8x128xf32, #tpu.memory_space<vmem>>, vector<1x8x128xf32>,
    %c0_36 = arith.constant 0 : index
    %c0_37 = arith.constant 0 : index
    %33 = vector.load %arg4[%c0_36, %c0_37] : memref<128x128xf32, #tpu.memory_space<vmem>>, vector<128x128xf32>
    %cst_38 = arith.constant dense<0.000000e+00> : vector<8x128xf32>
    %34 = tpu.matmul %29, %33, %cst_38 {dimension_numbers = #tpu.dot_dimension_numbers<[1], [0], [0], [1], [0, 0, 1, 1], [], []>, precision = #tpu.contract_precision<fp32>} : vector<8x128xf32>, vector<128x128xf32>, vector<8x128xf32> -> vector<8x128xf32>
    %c0_39 = arith.constant 0 : index
    %c0_40 = arith.constant 0 : index
    %35 = vector.load %arg5[%c0_39, %c0_40] : memref<1x128xf32, #tpu.memory_space<vmem>>, vector<1x128xf32>
    %36 = vector.broadcast %35 : vector<1x128xf32> to vector<8x128xf32>
    %37 = arith.addf %34, %36 : vector<8x128xf32>
    %c0_41 = arith.constant 0 : index
    %c0_42 = arith.constant 0 : index
    %38 = vector.load %arg6[%c0_41, %c0_42] : memref<8x128xf32, #tpu.memory_space<vmem>>, vector<8x128xf32>
    tpu.vector_store %arg6[%c0_41, %c0_42], %37 {strides = array<i32>} : memref<8x128xf32, #tpu.memory_space<vmem>>, vector<8x128xf32>,
    return
  }
}

</mosaic_0001>

<bundles_post_ra>
// kernel: custom_rnn_forward.1
= control target key start
LH: loop header
LB: loop body
LE: loop exit
PB: predicated region body
PF: predicated region fallthrough
CT: control target
= control target key end

     0   :  { %13 = vsyncpa [#allocation4], 0  ;;  %s3287_s0 = inlined_call_operand.vmem [shape: f32[8,128], index: 0, kind: input, shape index: {}]   ;;  %s3288_s1 = inlined_call_operand.hbm [shape: f32[2,256,128], index: 1, kind: input, shape index: {}]   ;;  %s3289_s2 = inlined_call_operand.vmem [shape: f32[2,1,128], index: 2, kind: input, shape index: {}]   ;;  %s3290_s3 = inlined_call_operand.vmem [shape: f32[2,8,128], index: 3, kind: input, shape index: {}, may-alias: {3,7}]   ;;  %s3291_s4 = inlined_call_operand.hbm [shape: f32[128,128], index: 4, kind: input, shape index: {}]   ;;  %s3292_s5 = inlined_call_operand.vmem [shape: f32[1,128], index: 5, kind: input, shape index: {}]   ;;  %s3293_s6 = inlined_call_operand.hbm [shape: f32[8,128], index: 6, kind: output, shape index: {0}]   ;;  %s3294_s7 = inlined_call_operand.vmem [shape: f32[2,8,128], index: 7, kind: output, shape index: {1}, may-alias: {3,7}]  }
   0x1   :  { %14 = vsyncpa [#allocation7], 0 }
   0x2   :  { %15 = vsyncpa [#allocation5], 0  ;;  %s22_s26 = sshll.u32 %s3288_s1, 4  ;;  %s1990_s27 = smov [#allocation3]   ;;  %s23_s26 = int_to_ptr.hbm [resolvable:$true] %s22_s26 }
   0x3   :  { %s24_s28 = sshll.u32 %s1990_s27, 4  ;;  %s39_s8 = sshll.u32 %s3291_s4, 4  ;;  %s25_s28 = int_to_ptr.vmem [resolvable:$true] %s24_s28  ;;  %s40_s8 = int_to_ptr.hbm [resolvable:$true] %s39_s8 }
   0x4   :  { %s1991_s9 = smov 128   ;;  %s1992_s10 = smov 8  }
   0x5   :  { %30 = dma.hbm_to_vmem [thread:$0]  %s23_s26, 8192, %s25_s28, [#allocation4], %s1991_s9, %s1991_s9, %s1992_s10  }
   0x6   :  { %s1993_s11 = smov [#allocation6]  }
   0x7   :  { %s41_s12 = sshll.u32 %s1993_s11, 4  ;;  %s42_s12 = int_to_ptr.vmem [resolvable:$true] %s41_s12 }
   0x8   :  { %47 = dma.hbm_to_vmem [thread:$0]  %s40_s8, 2048, %s42_s12, [#allocation7], %s1991_s9, %s1991_s9, %s1992_s10  }
   0x9   :  { %1984 = dma.done.wait [#allocation4], 8192  }
   0xa   :  { %1985 = vsyncadd [#allocation4], 4294959104 }
   0xb   :  { %1986 = dma.done.wait [#allocation7], 2048  }
   0xc   :  { %1987 = vsyncadd [#allocation7], 4294965248  ;;  %v79_v0 = vld [vmem:[#allocation3 + $0x78] sm:$0xff]  ;;  %v78_v1 = vld [vmem:[#allocation3 + $0x70] sm:$0xff]  ;;  %s1882_s27 = sshll.u32 %s3293_s6, 4  ;;  %s1883_s27 = int_to_ptr.hbm [resolvable:$true] %s1882_s27 }
   0xd   :  { %v77_v2 = vld [vmem:[#allocation3 + $0x68] sm:$0xff]  ;;  %v2041_v3 = vand.u32 4294901760, %v79_v0  ;;  %v2043_v4 = vand.u32 4294901760, %v78_v1  ;;  %v76_v6 = vld [vmem:[#allocation3 + $0x60] sm:$0xff]  ;;  %v75_v7 = vld [vmem:[#allocation3 + $0x58] sm:$0xff] }
   0xe   :  { %v2045_v5 = vand.u32 4294901760, %v77_v2  ;;  %v74_v8 = vld [vmem:[#allocation3 + $0x50] sm:$0xff]  ;;  %v2047_v9 = vand.u32 4294901760, %v76_v6  ;;  %v2049_v10 = vand.u32 4294901760, %v75_v7  ;;  %v73_v12 = vld [vmem:[#allocation3 + $0x48] sm:$0xff]  ;;  %v72_v13 = vld [vmem:[#allocation3 + $0x40] sm:$0xff] }
   0xf   :  { %v2051_v11 = vand.u32 4294901760, %v74_v8  ;;  %101 = vmatpush.msra.mxu0 %v2041_v3  ;;  %v2055_v14 = vsub.f32 %v79_v0, %v2041_v3  ;;  %v2058_v15 = vsub.f32 %v78_v1, %v2043_v4  ;;  %297 = vmatpush.msra.mxu3 %v2041_v3  ;;  %v2064_v17 = vand.u32 4294901760, %v73_v12  ;;  %v71_v21 = vld [vmem:[#allocation3 + $0x38] sm:$0xff]  ;;  %v70_v26 = vld [vmem:[#allocation3 + $0x30] sm:$0xff]  ;;  %v69_v34 = vld [vmem:[#allocation3 + $0x28] sm:$0xff] }
  0x10   :  { %v2062_v16 = vsub.f32 %v77_v2, %v2045_v5  ;;  %v2067_v18 = vsub.f32 %v76_v6, %v2047_v9  ;;  %v2070_v19 = vsub.f32 %v75_v7, %v2049_v10  ;;  %v2080_v25 = vand.u32 4294901760, %v72_v13  ;;  %v68_v42 = vld [vmem:[#allocation3 + $0x20] sm:$0xff]  ;;  %v67_v47 = vld [vmem:[#allocation3 + $0x18] sm:$0xff]  ;;  %v66_v54 = vld [vmem:[#allocation3 + $0x10] sm:$0xff] }
  0x11   :  { %v2073_v20 = vsub.f32 %v74_v8, %v2051_v11  ;;  %103 = vmatpush.msra.mxu0 %v2043_v4  ;;  %244 = vmatpush.msra.mxu2 %v2055_v14  ;;  %v143_v22 = vand.u32 4294901760, %v2055_v14  ;;  %v3310_v23 = vand.u32 4294901760, %v2058_v15  ;;  %v2086_v29 = vsub.f32 %v73_v12, %v2064_v17  ;;  %v95_v59 = vld [vmem:[#allocation3 + $0xf8] sm:$0xff]  ;;  %v65_v61 = vld [vmem:[#allocation3 + $0x8] sm:$0xff]  ;;  %v64_v2 = vld [vmem:[#allocation3] sm:$0xff] }
  0x12   :  { %v3308_v24 = vand.u32 4294901760, %v2062_v16  ;;  %299 = vmatpush.msra.mxu3 %v2043_v4  ;;  %v3307_v27 = vand.u32 4294901760, %v2067_v18  ;;  %v3304_v28 = vand.u32 4294901760, %v2070_v19  ;;  %v2099_v33 = vand.u32 4294901760, %v71_v21  ;;  %v94_v6 = vld [vmem:[#allocation3 + $0xf0] sm:$0xff] }
  0x13   :  { %105 = vmatpush.msra.mxu0 %v2045_v5  ;;  %247 = vmatpush.msra.mxu2 %v2058_v15  ;;  %v144_v30 = vsub.f32 %v2055_v14, %v143_v22  ;;  %v150_v31 = vsub.f32 %v2058_v15, %v3310_v23  ;;  %v2102_v35 = vand.u32 4294901760, %v70_v26  ;;  %v3302_v36 = vand.u32 4294901760, %v2073_v20 }
  0x14   :  { %v156_v32 = vsub.f32 %v2062_v16, %v3308_v24  ;;  %301 = vmatpush.msra.mxu3 %v2045_v5  ;;  %v162_v39 = vsub.f32 %v2067_v18, %v3307_v27  ;;  %v2111_v40 = vsub.f32 %v72_v13, %v2080_v25  ;;  %v168_v41 = vsub.f32 %v2070_v19, %v3304_v28 }
  0x15   :  { %107 = vmatpush.msra.mxu0 %v2047_v9  ;;  %v145_v37 = vand.u32 4294901760, %v144_v30  ;;  %250 = vmatpush.msra.mxu2 %v2062_v16  ;;  %v151_v38 = vand.u32 4294901760, %v150_v31  ;;  %v2118_v44 = vand.u32 4294901760, %v69_v34  ;;  %v3301_v45 = vand.u32 4294901760, %v2086_v29 }
  0x16   :  { %303 = vmatpush.msra.mxu3 %v2047_v9  ;;  %v157_v43 = vand.u32 4294901760, %v156_v32  ;;  %v2122_v46 = vsub.f32 %v71_v21, %v2099_v33  ;;  %v174_v48 = vsub.f32 %v2073_v20, %v3302_v36  ;;  %v163_v49 = vand.u32 4294901760, %v162_v39  ;;  %v93_v32 = vld [vmem:[#allocation3 + $0xe8] sm:$0xff] }
  0x17   :  { %109 = vmatpush.msra.mxu0 %v2049_v10  ;;  %146 = vmatpush.msra.mxu1 %v145_v37  ;;  %v2130_v50 = vand.u32 4294901760, %v68_v42  ;;  %v3300_v51 = vand.u32 4294901760, %v2111_v40  ;;  %v2134_v52 = vsub.f32 %v70_v26, %v2102_v35  ;;  %v2138_v53 = vand.u32 4294901760, %v67_v47 }
  0x18   :  { %253 = vmatpush.msra.mxu2 %v2067_v18  ;;  %305 = vmatpush.msra.mxu3 %v2049_v10  ;;  %v169_v55 = vand.u32 4294901760, %v168_v41  ;;  %v180_v56 = vsub.f32 %v2086_v29, %v3301_v45  ;;  %v3299_v57 = vand.u32 4294901760, %v2122_v46  ;;  %v2146_v58 = vsub.f32 %v69_v34, %v2118_v44  ;;  %v88_v45 = vld [vmem:[#allocation3 + $0xc0] sm:$0xff] }
  0x19   :  { %111 = vmatpush.msra.mxu0 %v2051_v11  ;;  %152 = vmatpush.msra.mxu1 %v151_v38  ;;  %v175_v60 = vand.u32 4294901760, %v174_v48  ;;  %v186_v62 = vsub.f32 %v2111_v40, %v3300_v51  ;;  %v2154_v63 = vand.u32 4294901760, %v66_v54  ;;  %v3298_v0 = vand.u32 4294901760, %v2134_v52 }
  0x1a   :  { %256 = vmatpush.msra.mxu2 %v2070_v19  ;;  %307 = vmatpush.msra.mxu3 %v2051_v11  ;;  %v2158_v1 = vsub.f32 %v68_v42, %v2130_v50  ;;  %v2163_v7 = vsub.f32 %v67_v47, %v2138_v53  ;;  %v2165_v8 = vand.u32 4294901760, %v95_v59  ;;  %v181_v12 = vand.u32 4294901760, %v180_v56 }
  0x1b   :  { %113 = vmatpush.msra.mxu0 %v2064_v17  ;;  %158 = vmatpush.msra.mxu1 %v157_v43  ;;  %v192_v13 = vsub.f32 %v2122_v46, %v3299_v57  ;;  %v2171_v21 = vand.u32 4294901760, %v65_v61  ;;  %v3296_v26 = vand.u32 4294901760, %v2146_v58  ;;  %v2176_v30 = vand.u32 4294901760, %v64_v2  ;;  %v92_v43 = vld [vmem:[#allocation3 + $0xe0] sm:$0xff]  ;;  %v89_v57 = vld [vmem:[#allocation3 + $0xc8] sm:$0xff] }
  0x1c   :  { %259 = vmatpush.msra.mxu2 %v2073_v20  ;;  %309 = vmatpush.msra.mxu3 %v2064_v17  ;;  %v2178_v31 = vand.u32 4294901760, %v94_v6  ;;  %v187_v34 = vand.u32 4294901760, %v186_v62  ;;  %v198_v37 = vsub.f32 %v2134_v52, %v3298_v0  ;;  %v3295_v38 = vand.u32 4294901760, %v2158_v1 }
  0x1d   :  { %115 = vmatpush.msra.mxu0 %v2080_v25  ;;  %164 = vmatpush.msra.mxu1 %v163_v49  ;;  %3321 = vst [vmem:[#allocation12_spill] sm:$0xff] %v2176_v30  ;;  %v2186_v39 = vsub.f32 %v66_v54, %v2154_v63  ;;  %v3297_v41 = vand.u32 4294901760, %v2163_v7  ;;  %v2192_v42 = vsub.f32 %v95_v59, %v2165_v8  ;;  %v193_v47 = vand.u32 4294901760, %v192_v13  ;;  %v91_v59 = vld [vmem:[#allocation3 + $0xd8] sm:$0xff]  ;;  %v90_v13 = vld [vmem:[#allocation3 + $0xd0] sm:$0xff] }
  0x1e   :  { %262 = vmatpush.msra.mxu2 %v2086_v29  ;;  %311 = vmatpush.msra.mxu3 %v2080_v25  ;;  %v204_v48 = vsub.f32 %v2146_v58, %v3296_v26  ;;  %v2199_v49 = vsub.f32 %v65_v61, %v2171_v21  ;;  %v2201_v54 = vand.u32 4294901760, %v93_v32  ;;  %v2209_v56 = vsub.f32 %v94_v6, %v2178_v31 }
  0x1f   :  { %117 = vmatpush.msra.mxu0 %v2099_v33  ;;  %170 = vmatpush.msra.mxu1 %v169_v55  ;;  %v2206_v55 = vsub.f32 %v64_v2, %v2176_v30  ;;  %v210_v61 = vsub.f32 %v2158_v1, %v3295_v38  ;;  %v3303_v62 = vand.u32 4294901760, %v2186_v39  ;;  %v216_v2 = vsub.f32 %v2163_v7, %v3297_v41 }
  0x20   :  { %265 = vmatpush.msra.mxu2 %v2111_v40  ;;  %313 = vmatpush.msra.mxu3 %v2099_v33  ;;  %v3305_v6 = vand.u32 4294901760, %v2192_v42  ;;  %v2227_v38 = vsub.f32 %v93_v32, %v2201_v54  ;;  %v2229_v26 = vand.u32 4294901760, %v91_v59  ;;  %v3309_v0 = vand.u32 4294901760, %v2209_v56 }
  0x21   :  { %119 = vmatpush.msra.mxu0 %v2102_v35  ;;  %176 = vmatpush.msra.mxu1 %v175_v60  ;;  %v199_v60 = vand.u32 4294901760, %v198_v37  ;;  %v3306_v37 = vand.u32 4294901760, %v2199_v49  ;;  %v3311_v41 = vand.u32 4294901760, %v2206_v55  ;;  %v222_v32 = vsub.f32 %v2186_v39, %v3303_v62 }
  0x22   :  { %268 = vmatpush.msra.mxu2 %v2122_v46  ;;  %315 = vmatpush.msra.mxu3 %v2102_v35  ;;  %v2242_v51 = vand.u32 4294901760, %v90_v13  ;;  %v217_v36 = vand.u32 4294901760, %v216_v2  ;;  %v2255_v62 = vsub.f32 %v91_v59, %v2229_v26  ;;  %v2257_v28 = vand.u32 4294901760, %v89_v57  ;;  %v87_v2 = vld [vmem:[#allocation3 + $0xb8] sm:$0xff] }
  0x23   :  { %121 = vmatpush.msra.mxu0 %v2118_v44  ;;  %182 = vmatpush.msra.mxu1 %v181_v12  ;;  %v2216_v12 = vand.u32 4294901760, %v92_v43  ;;  %v234_v59 = vsub.f32 %v2206_v55, %v3311_v41  ;;  %v2277_v23 = vand.u32 4294901760, %v87_v2  ;;  %v3323_v14 = vand.u32 4294901760, %v2058_v15 }
  0x24   :  { %271 = vmatpush.msra.mxu2 %v2134_v52  ;;  %317 = vmatpush.msra.mxu3 %v2118_v44  ;;  %v2272_v24 = vsub.f32 %v90_v13, %v2242_v51  ;;  %v2285_v27 = vsub.f32 %v89_v57, %v2257_v28  ;;  %v3325_v15 = vand.u32 4294901760, %v2062_v16  ;;  %v3327_v16 = vand.u32 4294901760, %v2067_v18 }
  0x25   :  { %123 = vmatpush.msra.mxu0 %v2130_v50  ;;  %188 = vmatpush.msra.mxu1 %v187_v34  ;;  %v205_v34 = vand.u32 4294901760, %v204_v48  ;;  %v2240_v48 = vsub.f32 %v92_v43, %v2216_v12  ;;  %v228_v43 = vsub.f32 %v2199_v49, %v3306_v37  ;;  %v223_v37 = vand.u32 4294901760, %v222_v32 }
  0x26   :  { %274 = vmatpush.msra.mxu2 %v2146_v58  ;;  %319 = vmatpush.msra.mxu3 %v2130_v50  ;;  %v3322_v32 = vand.u32 4294901760, %v2227_v38  ;;  %v3329_v18 = vand.u32 4294901760, %v2070_v19 }
  0x27   :  { %125 = vmatpush.msra.mxu0 %v2138_v53  ;;  %194 = vmatpush.msra.mxu1 %v193_v47  ;;  %v211_v47 = vand.u32 4294901760, %v210_v61  ;;  %v86_v61 = vld [vmem:[#allocation3 + $0xb0] sm:$0xff] }
  0x28   :  { %277 = vmatpush.msra.mxu2 %v2158_v1  ;;  %321 = vmatpush.msra.mxu3 %v2138_v53  ;;  %v497_v41 = vsub.f32 %v2227_v38, %v3322_v32  ;;  %v3324_v32 = vand.u32 4294901760, %v2240_v48 }
  0x29   :  { %127 = vmatpush.msra.mxu0 %v2154_v63  ;;  %200 = vmatpush.msra.mxu1 %v199_v60  ;;  %v485_v60 = vsub.f32 %v2192_v42, %v3305_v6  ;;  %v2264_v6 = vand.u32 4294901760, %v88_v45 }
  0x2a   :  { %280 = vmatpush.msra.mxu2 %v2163_v7  ;;  %323 = vmatpush.msra.mxu3 %v2154_v63  ;;  %v503_v13 = vsub.f32 %v2240_v48, %v3324_v32 }
  0x2b   :  { %129 = vmatpush.msra.mxu0 %v2171_v21  ;;  %206 = vmatpush.msra.mxu1 %v205_v34  ;;  %v491_v34 = vsub.f32 %v2209_v56, %v3309_v0  ;;  %v486_v0 = vand.u32 4294901760, %v485_v60  ;;  %v85_v60 = vld [vmem:[#allocation3 + $0xa8] sm:$0xff] }
  0x2c   :  { %283 = vmatpush.msra.mxu2 %v2186_v39  ;;  %325 = vmatpush.msra.mxu3 %v2171_v21  ;;  %v2310_v57 = vand.u32 4294901760, %v85_v60 }
  0x2d   :  { %131 = vmatpush.msra.mxu0 %v2176_v30  ;;  %212 = vmatpush.msra.mxu1 %v211_v47  ;;  %v229_v47 = vand.u32 4294901760, %v228_v43  ;;  %v235_v43 = vand.u32 4294901760, %v234_v59  ;;  %v3326_v59 = vand.u32 4294901760, %v2255_v62 }
  0x2e   :  { %286 = vmatpush.msra.mxu2 %v2199_v49  ;;  %327 = vmatpush.msra.mxu3 %v2176_v30  ;;  %v2298_v30 = vand.u32 4294901760, %v86_v61 }
  0x2f   :  { %338 = vmatpush.msrb.mxu0 %v143_v22  ;;  %218 = vmatpush.msra.mxu1 %v217_v36  ;;  %v492_v22 = vand.u32 4294901760, %v491_v34  ;;  %v2291_v36 = vsub.f32 %v88_v45, %v2264_v6  ;;  %v2303_v45 = vsub.f32 %v87_v2, %v2277_v23  ;;  %v84_v34 = vld [vmem:[#allocation3 + $0xa0] sm:$0xff]  ;;  %v83_v2 = vld [vmem:[#allocation3 + $0x98] sm:$0xff] }
  0x30   :  { %289 = vmatpush.msra.mxu2 %v2206_v55  ;;  %487 = vmatpush.msrb.mxu3 %v486_v0  ;;  %v2322_v32 = vand.u32 4294901760, %v84_v34  ;;  %v2338_v19 = vand.u32 4294901760, %v83_v2 }
  0x31   :  { %342 = vmatpush.msrb.mxu0 %v3323_v14  ;;  %224 = vmatpush.msra.mxu1 %v223_v37  ;;  %v498_v37 = vand.u32 4294901760, %v497_v41  ;;  %v509_v14 = vsub.f32 %v2255_v62, %v3326_v59  ;;  %v3313_v0 = vand.u32 4294901760, %v2291_v36  ;;  %v3328_v41 = vand.u32 4294901760, %v2272_v24 }
  0x32   :  { %442 = vmatpush.msrb.mxu2 %v2165_v8  ;;  %493 = vmatpush.msrb.mxu3 %v492_v22  ;;  %v2320_v59 = vsub.f32 %v86_v61, %v2298_v30  ;;  %v3330_v61 = vand.u32 4294901760, %v2285_v27 }
  0x33   :  { %346 = vmatpush.msrb.mxu0 %v3325_v15  ;;  %230 = vmatpush.msra.mxu1 %v229_v47  ;;  %v504_v47 = vand.u32 4294901760, %v503_v13  ;;  %v515_v15 = vsub.f32 %v2272_v24, %v3328_v41  ;;  %v58_v13 = vld [vmem:[%s3287_s0] sm:$0xff]  ;;  %v2336_v41 = vsub.f32 %v85_v60, %v2310_v57  ;;  %v2349_v60 = vsub.f32 %v84_v34, %v2322_v32 }
  0x34   :  { %444 = vmatpush.msrb.mxu2 %v2178_v31  ;;  %499 = vmatpush.msrb.mxu3 %v498_v37  ;;  %v82_v37 = vld [vmem:[#allocation3 + $0x90] sm:$0xff]  ;;  %v2351_v22 = vand.u32 4294901760, %v58_v13 }
  0x35   :  { %350 = vmatpush.msrb.mxu0 %v3327_v16  ;;  %236 = vmatpush.msra.mxu1 %v235_v43  ;;  %v510_v43 = vand.u32 4294901760, %v509_v14  ;;  %v521_v16 = vsub.f32 %v2285_v27, %v3330_v61  ;;  %v516_v14 = vand.u32 4294901760, %v515_v15  ;;  %v2361_v34 = vand.u32 4294901760, %v82_v37 }
  0x36   :  { %446 = vmatpush.msrb.mxu2 %v2201_v54  ;;  %505 = vmatpush.msrb.mxu3 %v504_v47  ;;  %v2364_v61 = vsub.f32 %v83_v2, %v2338_v19  ;;  %v2375_v15 = vsub.f32 %v58_v13, %v2351_v22 }
  0x37   :  { %354 = vmatpush.msrb.mxu0 %v3329_v18  ;;  %405 = vmatpush.msrb.mxu1 %v2041_v3  ;;  %v3331_v3 = vand.u32 4294901760, %v2073_v20  ;;  %v527_v18 = vsub.f32 %v2291_v36, %v3313_v0  ;;  %v3332_v20 = vand.u32 4294901760, %v2086_v29  ;;  %v81_v0 = vld [vmem:[#allocation3 + $0x88] sm:$0xff]  ;;  %v522_v47 = vand.u32 4294901760, %v521_v16 }
  0x38   :  { %448 = vmatpush.msrb.mxu2 %v2216_v12  ;;  %511 = vmatpush.msrb.mxu3 %v510_v43  ;;  %v3334_v29 = vand.u32 4294901760, %v2111_v40  ;;  %v3335_v43 = vand.u32 4294901760, %v2320_v59  ;;  %v2377_v2 = vand.u32 4294901760, %v81_v0  ;;  %v3336_v40 = vand.u32 4294901760, %v2122_v46 }
  0x39   :  { %358 = vmatpush.msrb.mxu0 %v3331_v3  ;;  %407 = vmatpush.msrb.mxu1 %v2043_v4  ;;  %v3333_v4 = vand.u32 4294901760, %v2303_v45  ;;  %v2388_v13 = vsub.f32 %v82_v37, %v2361_v34  ;;  %v3338_v46 = vand.u32 4294901760, %v2134_v52 }
  0x3a   :  { %450 = vmatpush.msrb.mxu2 %v2229_v26  ;;  %517 = vmatpush.msrb.mxu3 %v516_v14  ;;  %v539_v16 = vsub.f32 %v2320_v59, %v3335_v43  ;;  %v2401_v37 = vsub.f32 %v81_v0, %v2377_v2  ;;  %v3340_v0 = vand.u32 4294901760, %v2158_v1 }
  0x3b   :  { %362 = vmatpush.msrb.mxu0 %v3332_v20  ;;  %409 = vmatpush.msrb.mxu1 %v2045_v5  ;;  %v533_v3 = vsub.f32 %v2303_v45, %v3333_v4  ;;  %v528_v5 = vand.u32 4294901760, %v527_v18  ;;  %v80_v20 = vld [vmem:[#allocation3 + $0x80] sm:$0xff]  ;;  %v550_v4 = vand.u32 4294901760, %v2349_v60  ;;  %v3337_v18 = vand.u32 4294901760, %v2336_v41 }
  0x3c   :  { %452 = vmatpush.msrb.mxu2 %v2242_v51  ;;  %523 = vmatpush.msrb.mxu3 %v522_v47  ;;  %v2390_v43 = vand.u32 4294901760, %v80_v20  ;;  %v134_v47 = vand.u32 4294901760, %v2375_v15 }
  0x3d   :  { %366 = vmatpush.msrb.mxu0 %v3334_v29  ;;  %411 = vmatpush.msrb.mxu1 %v2047_v9  ;;  %v534_v9 = vand.u32 4294901760, %v533_v3  ;;  %v545_v14 = vsub.f32 %v2336_v41, %v3337_v18  ;;  %v556_v29 = vand.u32 4294901760, %v2364_v61  ;;  %v551_v3 = vsub.f32 %v2349_v60, %v550_v4 }
  0x3e   :  { %454 = vmatpush.msrb.mxu2 %v2257_v28  ;;  %529 = vmatpush.msrb.mxu3 %v528_v5  ;;  %v562_v5 = vand.u32 4294901760, %v2388_v13  ;;  %v568_v18 = vand.u32 4294901760, %v2401_v37 }
  0x3f   :  { %370 = vmatpush.msrb.mxu0 %v3336_v40  ;;  %413 = vmatpush.msrb.mxu1 %v2049_v10  ;;  %v540_v10 = vand.u32 4294901760, %v539_v16  ;;  %v3339_v40 = vand.u32 4294901760, %v2146_v58  ;;  %v557_v52 = vsub.f32 %v2364_v61, %v556_v29  ;;  %v2412_v16 = vsub.f32 %v80_v20, %v2390_v43 }
  0x40   :  { %456 = vmatpush.msrb.mxu2 %v2264_v6  ;;  %535 = vmatpush.msrb.mxu3 %v534_v9  ;;  %v552_v58 = vand.u32 4294901760, %v551_v3  ;;  %v135_v9 = vsub.f32 %v2375_v15, %v134_v47  ;;  %v3341_v20 = vand.u32 4294901760, %v2163_v7  ;;  %v563_v1 = vsub.f32 %v2388_v13, %v562_v5 }
  0x41   :  { %374 = vmatpush.msrb.mxu0 %v3338_v46  ;;  %415 = vmatpush.msrb.mxu1 %v2051_v11  ;;  %v546_v11 = vand.u32 4294901760, %v545_v14  ;;  %v574_v14 = vand.u32 4294901760, %v2412_v16  ;;  %v569_v7 = vsub.f32 %v2401_v37, %v568_v18  ;;  %v3343_v3 = vand.u32 4294901760, %v2199_v49 }
  0x42   :  { %458 = vmatpush.msrb.mxu2 %v2277_v23  ;;  %541 = vmatpush.msrb.mxu3 %v540_v10  ;;  %v3342_v10 = vand.u32 4294901760, %v2186_v39  ;;  %v564_v39 = vand.u32 4294901760, %v563_v1 }
  0x43   :  { %378 = vmatpush.msrb.mxu0 %v3339_v40  ;;  %417 = vmatpush.msrb.mxu1 %v2064_v17  ;;  %v60_v17 = vld [vmem:[%s3290_s3] sm:$0xff] }
  0x44   :  { %460 = vmatpush.msrb.mxu2 %v2298_v30  ;;  %547 = vmatpush.msrb.mxu3 %v546_v11  ;;  %v2431_v46 = vand.u32 4294901760, %v60_v17  ;;  %v3344_v11 = vand.u32 4294901760, %v2206_v55  ;;  %v3347_v55 = vld [vmem:[#allocation12_spill] sm:$0xff] }
  0x45   :  { %382 = vmatpush.msrb.mxu0 %v3340_v0  ;;  %419 = vmatpush.msrb.mxu1 %v2080_v25  ;;  %v558_v25 = vand.u32 4294901760, %v557_v52  ;;  %v800_v0 = vld [vmem:[#allocation3 + $0x148] sm:$0xff] }
  0x46   :  { %462 = vmatpush.msrb.mxu2 %v2310_v57  ;;  %553 = vmatpush.msrb.mxu3 %v552_v58  ;;  %v2448_v40 = vsub.f32 %v60_v17, %v2431_v46 }
  0x47   :  { %386 = vmatpush.msrb.mxu0 %v3341_v20  ;;  %421 = vmatpush.msrb.mxu1 %v2099_v33  ;;  %v136_v33 = vand.u32 4294901760, %v135_v9  ;;  %v2616_v9 = vand.u32 4294901760, %v800_v0 }
  0x48   :  { %464 = vmatpush.msrb.mxu2 %v2322_v32  ;;  %559 = vmatpush.msrb.mxu3 %v558_v25  ;;  %v475_v52 = vand.u32 4294901760, %v2448_v40 }
  0x49   :  { %390 = vmatpush.msrb.mxu0 %v3342_v10  ;;  %423 = vmatpush.msrb.mxu1 %v2102_v35  ;;  %v575_v35 = vsub.f32 %v2412_v16, %v574_v14  ;;  %v2625_v1 = vsub.f32 %v800_v0, %v2616_v9 }
  0x4a   :  { %466 = vmatpush.msrb.mxu2 %v2338_v19  ;;  %137 = vmatmul.f32.vlgmr.msra.gmra.mxu0 %v136_v33 }
  0x4b   :  { %394 = vmatpush.msrb.mxu0 %v3343_v3  ;;  %425 = vmatpush.msrb.mxu1 %v2118_v44  ;;  %v570_v44 = vand.u32 4294901760, %v569_v7  ;;  %v576_v49 = vand.u32 4294901760, %v575_v35  ;;  %v907_v7 = vand.u32 4294901760, %v2625_v1  ;;  %v797_v35 = vld [vmem:[#allocation3 + $0x130] sm:$0xff] }
  0x4c   :  { %468 = vmatpush.msrb.mxu2 %v2361_v34  ;;  %565 = vmatpush.msrb.mxu3 %v564_v39 }
  0x4d   :  { %398 = vmatpush.msrb.mxu0 %v3344_v11  ;;  %427 = vmatpush.msrb.mxu1 %v2130_v50  ;;  %v3345_v50 = vand.u32 4294901760, %v2192_v42  ;;  %v908_v11 = vsub.f32 %v2625_v1, %v907_v7 }
  0x4e   :  { %470 = vmatpush.msrb.mxu2 %v2377_v2  ;;  %571 = vmatpush.msrb.mxu3 %v570_v44 }
  0x4f   :  { %585 = vmatpush.msra.mxu0 %v2192_v42  ;;  %429 = vmatpush.msrb.mxu1 %v2138_v53  ;;  %v476_v53 = vsub.f32 %v2448_v40, %v475_v52 }
  0x50   :  { %472 = vmatpush.msrb.mxu2 %v2390_v43  ;;  %577 = vmatpush.msrb.mxu3 %v576_v49  ;;  %v2648_v49 = vand.u32 4294901760, %v797_v35 }
  0x51   :  { %588 = vmatpush.msra.mxu0 %v2209_v56  ;;  %431 = vmatpush.msrb.mxu1 %v2154_v63  ;;  %v3346_v63 = vand.u32 4294901760, %v2209_v56  ;;  %v477_v42 = vand.u32 4294901760, %v476_v53  ;;  %v3349_v56 = vand.u32 4294901760, %v2240_v48  ;;  %v909_v53 = vand.u32 4294901760, %v908_v11 }
  0x52   :  { %292 = vmatmul.f32.vlgmr.msra.gmra.mxu2 %v2375_v15  ;;  %331 = vmatmul.f32.vlgmr.msra.gmra.mxu3 %v134_v47 }
  0x53   :  { %591 = vmatpush.msra.mxu0 %v2227_v38  ;;  %679 = vmatpush.msra.mxu2 %v3345_v50  ;;  %v796_v50 = vld [vmem:[#allocation3 + $0x128] sm:$0xff] }
  0x54   :  { %433 = vmatpush.msrb.mxu1 %v2171_v21  ;;  %746 = vmatpush.msra.mxu3 %v2165_v8  ;;  %v3348_v21 = vand.u32 4294901760, %v2227_v38  ;;  %v3350_v38 = vand.u32 4294901760, %v2255_v62 }
  0x55   :  { %594 = vmatpush.msra.mxu0 %v2240_v48  ;;  %683 = vmatpush.msra.mxu2 %v3346_v63  ;;  %v3355_v48 = vand.u32 4294901760, %v2320_v59 }
  0x56   :  { %435 = vmatpush.msrb.mxu1 %v3347_v55  ;;  %748 = vmatpush.msra.mxu3 %v2178_v31  ;;  %v2659_v55 = vsub.f32 %v797_v35, %v2648_v49 }
  0x57   :  { %597 = vmatpush.msra.mxu0 %v2255_v62  ;;  %238 = vmatmul.f32.vlgmr.msra.gmra.mxu1 %v2351_v22  ;;  %v805_v62 = vld [vmem:[#allocation3 + $0x170] sm:$0xff] }
  0x58   :  { %687 = vmatpush.msra.mxu2 %v3348_v21  ;;  %638 = vmatpush.msra.mxu1 %v2165_v8  ;;  %v3351_v8 = vand.u32 4294901760, %v2272_v24  ;;  %v2661_v21 = vand.u32 4294901760, %v796_v50 }
  0x59   :  { %600 = vmatpush.msra.mxu0 %v2272_v24  ;;  %750 = vmatpush.msra.mxu3 %v2201_v54  ;;  %v3353_v24 = vand.u32 4294901760, %v2291_v36 }
  0x5a   :  { %691 = vmatpush.msra.mxu2 %v3349_v56  ;;  %640 = vmatpush.msra.mxu1 %v2178_v31  ;;  %v3352_v31 = vand.u32 4294901760, %v2285_v27  ;;  %v795_v56 = vld [vmem:[#allocation3 + $0x120] sm:$0xff] }
  0x5b   :  { %478 = vmatmul.f32.vlgmr.msrb.gmra.mxu2 %v477_v42  ;;  %603 = vmatpush.msra.mxu0 %v2285_v27  ;;  %v3354_v27 = vand.u32 4294901760, %v2303_v45 }
  0x5c   :  { %642 = vmatpush.msra.mxu1 %v2201_v54  ;;  %695 = vmatpush.msra.mxu2 %v3350_v38  ;;  %v806_v54 = vld [vmem:[#allocation3 + $0x178] sm:$0xff] }
  0x5d   :  { %752 = vmatpush.msra.mxu3 %v2216_v12  ;;  %400 = vmatmul.f32.vlgmr.msrb.gmra.mxu0 %v2351_v22 }
  0x5e   :  { %579 = vmatmul.f32.vlgmr.msrb.gmra.mxu3 %v2431_v46  ;;  %606 = vmatpush.msra.mxu0 %v2291_v36 }
  0x5f   :  { %644 = vmatpush.msra.mxu1 %v2216_v12  ;;  %699 = vmatpush.msra.mxu2 %v3351_v8  ;;  %v804_v12 = vld [vmem:[#allocation3 + $0x168] sm:$0xff]  ;;  %v925_v8 = vand.u32 4294901760, %v2659_v55 }
  0x60   :  { %754 = vmatpush.msra.mxu3 %v2229_v26  ;;  %437 = vmatmul.f32.vlgmr.msrb.gmra.mxu1 %v2351_v22  ;;  %v2526_v36 = vand.u32 4294901760, %v804_v12 }
  0x61   :  { %609 = vmatpush.msra.mxu0 %v2303_v45  ;;  %646 = vmatpush.msra.mxu1 %v2229_v26  ;;  %v2509_v26 = vand.u32 4294901760, %v806_v54  ;;  %v3356_v45 = vand.u32 4294901760, %v2336_v41 }
  0x62   :  { %703 = vmatpush.msra.mxu2 %v3352_v31  ;;  %756 = vmatpush.msra.mxu3 %v2242_v51  ;;  %v2668_v31 = vsub.f32 %v796_v50, %v2661_v21 }
  0x63   :  { %612 = vmatpush.msra.mxu0 %v2320_v59  ;;  %648 = vmatpush.msra.mxu1 %v2242_v51  ;;  %v2516_v51 = vand.u32 4294901760, %v805_v62  ;;  %v2543_v59 = vsub.f32 %v804_v12, %v2526_v36 }
  0x64   :  { %707 = vmatpush.msra.mxu2 %v3353_v24  ;;  %758 = vmatpush.msra.mxu3 %v2257_v28  ;;  %v931_v12 = vand.u32 4294901760, %v2668_v31 }
  0x65   :  { %615 = vmatpush.msra.mxu0 %v2336_v41  ;;  %650 = vmatpush.msra.mxu1 %v2257_v28  ;;  %v2524_v28 = vsub.f32 %v806_v54, %v2509_v26  ;;  %v883_v22 = vand.u32 4294901760, %v2543_v59  ;;  %v803_v41 = vld [vmem:[#allocation3 + $0x160] sm:$0xff]  ;;  %v2671_v54 = vand.u32 4294901760, %v795_v56 }
  0x66   :  { %711 = vmatpush.msra.mxu2 %v3354_v27  ;;  %760 = vmatpush.msra.mxu3 %v2264_v6  ;;  %v926_v27 = vsub.f32 %v2659_v55, %v925_v8 }
  0x67   :  { %618 = vmatpush.msra.mxu0 %v2349_v60  ;;  %652 = vmatpush.msra.mxu1 %v2264_v6  ;;  %v2534_v6 = vsub.f32 %v805_v62, %v2516_v51  ;;  %v2578_v60 = vand.u32 4294901760, %v803_v41  ;;  %v794_v62 = vld [vmem:[#allocation3 + $0x118] sm:$0xff] }
  0x68   :  { %715 = vmatpush.msra.mxu2 %v3355_v48  ;;  %762 = vmatpush.msra.mxu3 %v2277_v23  ;;  %v2683_v48 = vsub.f32 %v795_v56, %v2671_v54 }
  0x69   :  { %621 = vmatpush.msra.mxu0 %v2364_v61  ;;  %654 = vmatpush.msra.mxu1 %v2277_v23  ;;  %v871_v23 = vand.u32 4294901760, %v2524_v28  ;;  %v884_v61 = vsub.f32 %v2543_v59, %v883_v22 }
  0x6a   :  { %719 = vmatpush.msra.mxu2 %v3356_v45  ;;  %764 = vmatpush.msra.mxu3 %v2298_v30  ;;  %v2686_v45 = vand.u32 4294901760, %v794_v62 }
  0x6b   :  { %624 = vmatpush.msra.mxu0 %v2388_v13  ;;  %656 = vmatpush.msra.mxu1 %v2298_v30  ;;  %v877_v30 = vand.u32 4294901760, %v2534_v6 }
  0x6c   :  { %723 = vmatpush.msra.mxu2 %v550_v4  ;;  %766 = vmatpush.msra.mxu3 %v2310_v57  ;;  %v2589_v4 = vsub.f32 %v803_v41, %v2578_v60  ;;  %v927_v41 = vand.u32 4294901760, %v926_v27 }
  0x6d   :  { %627 = vmatpush.msra.mxu0 %v2401_v37  ;;  %658 = vmatpush.msra.mxu1 %v2310_v57  ;;  %v872_v57 = vsub.f32 %v2524_v28, %v871_v23 }
  0x6e   :  { %727 = vmatpush.msra.mxu2 %v556_v29  ;;  %768 = vmatpush.msra.mxu3 %v2322_v32  ;;  %v802_v29 = vld [vmem:[#allocation3 + $0x158] sm:$0xff] }
  0x6f   :  { %630 = vmatpush.msra.mxu0 %v2412_v16  ;;  %660 = vmatpush.msra.mxu1 %v2322_v32  ;;  %v878_v32 = vsub.f32 %v2534_v6, %v877_v30  ;;  %v2598_v13 = vand.u32 4294901760, %v802_v29 }
  0x70   :  { %731 = vmatpush.msra.mxu2 %v562_v5  ;;  %770 = vmatpush.msra.mxu3 %v2338_v19  ;;  %v801_v5 = vld [vmem:[#allocation3 + $0x150] sm:$0xff] }
  0x71   :  { %633 = vmatmul.f32.vlgmr.msra.gmra.mxu0 %v2448_v40  ;;  %662 = vmatpush.msra.mxu1 %v2338_v19  ;;  %v873_v19 = vand.u32 4294901760, %v872_v57  ;;  %v879_v15 = vand.u32 4294901760, %v878_v32  ;;  %v2604_v47 = vsub.f32 %v802_v29, %v2598_v13  ;;  %v2609_v16 = vand.u32 4294901760, %v801_v5  ;;  %v793_v32 = vld [vmem:[#allocation3 + $0x110] sm:$0xff]  ;;  %v792_v29 = vld [vmem:[#allocation3 + $0x108] sm:$0xff] }
  0x72   :  { %735 = vmatpush.msra.mxu2 %v568_v18  ;;  %772 = vmatpush.msra.mxu3 %v2361_v34  ;;  %v799_v18 = vld [vmem:[#allocation3 + $0x140] sm:$0xff]  ;;  %v2707_v0 = vand.u32 4294901760, %v792_v29 }
  0x73   :  { %664 = vmatpush.msra.mxu1 %v2361_v34  ;;  %829 = vmatpush.msrb.mxu0 %v2509_v26  ;;  %v885_v34 = vand.u32 4294901760, %v884_v61  ;;  %v895_v17 = vand.u32 4294901760, %v2604_v47  ;;  %v2613_v58 = vsub.f32 %v801_v5, %v2609_v16  ;;  %v937_v61 = vand.u32 4294901760, %v2683_v48 }
  0x74   :  { %739 = vmatpush.msra.mxu2 %v574_v14  ;;  %774 = vmatpush.msra.mxu3 %v2377_v2  ;;  %v2628_v14 = vand.u32 4294901760, %v799_v18  ;;  %v2722_v11 = vsub.f32 %v792_v29, %v2707_v0 }
  0x75   :  { %741 = vmatmul.f32.vlgmr.msra.gmra.mxu2 %v2431_v46  ;;  %666 = vmatpush.msra.mxu1 %v2377_v2  ;;  %v889_v2 = vand.u32 4294901760, %v2589_v4  ;;  %v896_v20 = vsub.f32 %v2604_v47, %v895_v17  ;;  %v901_v25 = vand.u32 4294901760, %v2613_v58 }
  0x76   :  { %776 = vmatpush.msra.mxu3 %v2390_v43  ;;  %972 = vmatpush.msrb.mxu2 %v2524_v28  ;;  %v2637_v3 = vsub.f32 %v799_v18, %v2628_v14  ;;  %v791_v18 = vld [vmem:[#allocation3 + $0x100] sm:$0xff]  ;;  %v818_v28 = vld [vmem:[#allocation3 + $0x1d8] sm:$0xff] }
  0x77   :  { %778 = vmatmul.f32.vlgmr.msra.gmra.mxu3 %v2431_v46  ;;  %668 = vmatpush.msra.mxu1 %v2390_v43  ;;  %v890_v43 = vsub.f32 %v2589_v4, %v889_v2  ;;  %v798_v46 = vld [vmem:[#allocation3 + $0x138] sm:$0xff]  ;;  %v897_v10 = vand.u32 4294901760, %v896_v20  ;;  %v902_v33 = vsub.f32 %v2613_v58, %v901_v25 }
  0x78   :  { %672 = vmatmul.f32.vlgmr.msra.gmra.mxu1 %v475_v52  ;;  %975 = vmatpush.msrb.mxu2 %v2534_v6  ;;  %v2640_v39 = vand.u32 4294901760, %v798_v46  ;;  %v913_v44 = vand.u32 4294901760, %v2637_v3  ;;  %v822_v20 = vld [vmem:[#allocation3 + $0x1f8] sm:$0xff] }
  0x79   :  { %874 = vmatpush.msrb.mxu1 %v873_v19  ;;  %1025 = vmatpush.msrb.mxu3 %v2509_v26  ;;  %v891_v37 = vand.u32 4294901760, %v890_v43  ;;  %v903_v40 = vand.u32 4294901760, %v902_v33  ;;  %v932_v19 = vsub.f32 %v2668_v31, %v931_v12  ;;  %v2715_v33 = vand.u32 4294901760, %v822_v20 }
  0x7a   :  { %831 = vmatpush.msrb.mxu0 %v2516_v51  ;;  %978 = vmatpush.msrb.mxu2 %v2543_v59  ;;  %v2651_v52 = vsub.f32 %v798_v46, %v2640_v39  ;;  %v914_v63 = vsub.f32 %v2637_v3, %v913_v44 }
  0x7b   :  { %880 = vmatpush.msrb.mxu1 %v879_v15  ;;  %1027 = vmatpush.msrb.mxu3 %v2516_v51  ;;  %v2695_v15 = vsub.f32 %v794_v62, %v2686_v45  ;;  %v933_v43 = vand.u32 4294901760, %v932_v19 }
  0x7c   :  { %833 = vmatpush.msrb.mxu0 %v2526_v36  ;;  %981 = vmatpush.msrb.mxu2 %v2589_v4  ;;  %v919_v42 = vand.u32 4294901760, %v2651_v52  ;;  %v915_v38 = vand.u32 4294901760, %v914_v63  ;;  %v2731_v63 = vsub.f32 %v822_v20, %v2715_v33  ;;  %v815_v4 = vld [vmem:[#allocation3 + $0x1c0] sm:$0xff] }
  0x7d   :  { %886 = vmatpush.msrb.mxu1 %v885_v34  ;;  %1029 = vmatpush.msrb.mxu3 %v2526_v36  ;;  %v2699_v34 = vand.u32 4294901760, %v793_v32  ;;  %v943_v5 = vand.u32 4294901760, %v2695_v15 }
  0x7e   :  { %835 = vmatpush.msrb.mxu0 %v2578_v60  ;;  %984 = vmatpush.msrb.mxu2 %v2604_v47  ;;  %v920_v24 = vsub.f32 %v2651_v52, %v919_v42  ;;  %v3314_v29 = vand.u32 4294901760, %v2731_v63 }
  0x7f   :  { %1031 = vmatpush.msrb.mxu3 %v2578_v60  ;;  %892 = vmatpush.msrb.mxu1 %v891_v37  ;;  %v938_v37 = vsub.f32 %v2683_v48, %v937_v61  ;;  %v2711_v46 = vsub.f32 %v793_v32, %v2699_v34 }
  0x80   :  { %837 = vmatpush.msrb.mxu0 %v2598_v13  ;;  %987 = vmatpush.msrb.mxu2 %v2613_v58  ;;  %v921_v57 = vand.u32 4294901760, %v920_v24  ;;  %v821_v24 = vld [vmem:[#allocation3 + $0x1f0] sm:$0xff] }
  0x81   :  { %1033 = vmatpush.msrb.mxu3 %v2598_v13  ;;  %898 = vmatpush.msrb.mxu1 %v897_v10  ;;  %v2713_v10 = vand.u32 4294901760, %v791_v18  ;;  %v939_v35 = vand.u32 4294901760, %v938_v37  ;;  %v949_v50 = vand.u32 4294901760, %v2711_v46  ;;  %v2740_v27 = vand.u32 4294901760, %v821_v24 }
  0x82   :  { %839 = vmatpush.msrb.mxu0 %v2609_v16  ;;  %990 = vmatpush.msrb.mxu2 %v2625_v1 }
  0x83   :  { %1035 = vmatpush.msrb.mxu3 %v2609_v16  ;;  %904 = vmatpush.msrb.mxu1 %v903_v40  ;;  %v944_v40 = vsub.f32 %v2695_v15, %v943_v5  ;;  %v950_v62 = vsub.f32 %v2711_v46, %v949_v50  ;;  %v2753_v37 = vsub.f32 %v821_v24, %v2740_v27 }
  0x84   :  { %841 = vmatpush.msrb.mxu0 %v2616_v9  ;;  %993 = vmatpush.msrb.mxu2 %v2637_v3 }
  0x85   :  { %1037 = vmatpush.msrb.mxu3 %v2616_v9  ;;  %910 = vmatpush.msrb.mxu1 %v909_v53  ;;  %v2728_v53 = vsub.f32 %v791_v18, %v2713_v10  ;;  %v945_v56 = vand.u32 4294901760, %v944_v40  ;;  %v951_v19 = vand.u32 4294901760, %v950_v62  ;;  %v1213_v40 = vsub.f32 %v2731_v63, %v3314_v29 }
  0x86   :  { %843 = vmatpush.msrb.mxu0 %v2628_v14  ;;  %996 = vmatpush.msrb.mxu2 %v2651_v52  ;;  %v2776_v29 = vand.u32 4294901760, %v818_v28 }
  0x87   :  { %1039 = vmatpush.msrb.mxu3 %v2628_v14  ;;  %916 = vmatpush.msrb.mxu1 %v915_v38  ;;  %v955_v38 = vand.u32 4294901760, %v2722_v11  ;;  %v3315_v32 = vand.u32 4294901760, %v2728_v53 }
  0x88   :  { %845 = vmatpush.msrb.mxu0 %v2640_v39  ;;  %999 = vmatpush.msrb.mxu2 %v2659_v55 }
  0x89   :  { %1041 = vmatpush.msrb.mxu3 %v2640_v39  ;;  %922 = vmatpush.msrb.mxu1 %v921_v57  ;;  %v956_v57 = vsub.f32 %v2722_v11, %v955_v38  ;;  %v962_v20 = vsub.f32 %v2728_v53, %v3315_v32 }
  0x8a   :  { %847 = vmatpush.msrb.mxu0 %v2648_v49  ;;  %1002 = vmatpush.msrb.mxu2 %v2668_v31 }
  0x8b   :  { %1043 = vmatpush.msrb.mxu3 %v2648_v49  ;;  %928 = vmatpush.msrb.mxu1 %v927_v41  ;;  %v820_v41 = vld [vmem:[#allocation3 + $0x1e8] sm:$0xff]  ;;  %v957_v18 = vand.u32 4294901760, %v956_v57  ;;  %v963_v62 = vand.u32 4294901760, %v962_v20 }
  0x8c   :  { %849 = vmatpush.msrb.mxu0 %v2661_v21  ;;  %1005 = vmatpush.msrb.mxu2 %v2683_v48 }
  0x8d   :  { %1045 = vmatpush.msrb.mxu3 %v2661_v21  ;;  %934 = vmatpush.msrb.mxu1 %v933_v43  ;;  %v2750_v43 = vand.u32 4294901760, %v820_v41 }
  0x8e   :  { %851 = vmatpush.msrb.mxu0 %v2671_v54  ;;  %1008 = vmatpush.msrb.mxu2 %v2695_v15 }
  0x8f   :  { %1047 = vmatpush.msrb.mxu3 %v2671_v54  ;;  %940 = vmatpush.msrb.mxu1 %v939_v35  ;;  %v819_v35 = vld [vmem:[#allocation3 + $0x1e0] sm:$0xff]  ;;  %v2771_v57 = vsub.f32 %v820_v41, %v2750_v43 }
  0x90   :  { %853 = vmatpush.msrb.mxu0 %v2686_v45  ;;  %1011 = vmatpush.msrb.mxu2 %v2711_v46  ;;  %v2765_v24 = vand.u32 4294901760, %v819_v35 }
  0x91   :  { %1049 = vmatpush.msrb.mxu3 %v2686_v45  ;;  %946 = vmatpush.msrb.mxu1 %v945_v56  ;;  %v1218_v56 = vand.u32 4294901760, %v2753_v37  ;;  %v3317_v6 = vand.u32 4294901760, %v2771_v57 }
  0x92   :  { %855 = vmatpush.msrb.mxu0 %v2699_v34  ;;  %1014 = vmatpush.msrb.mxu2 %v2722_v11  ;;  %v2779_v32 = vsub.f32 %v819_v35, %v2765_v24 }
  0x93   :  { %1051 = vmatpush.msrb.mxu3 %v2699_v34  ;;  %952 = vmatpush.msrb.mxu1 %v951_v19  ;;  %v1219_v19 = vsub.f32 %v2753_v37, %v1218_v56  ;;  %v1225_v59 = vsub.f32 %v2771_v57, %v3317_v6  ;;  %v2818_v6 = vand.u32 4294901760, %v815_v4 }
  0x94   :  { %857 = vmatpush.msrb.mxu0 %v2707_v0  ;;  %1017 = vmatpush.msrb.mxu2 %v2728_v53 }
  0x95   :  { %1053 = vmatpush.msrb.mxu3 %v2707_v0  ;;  %958 = vmatpush.msrb.mxu1 %v957_v18  ;;  %v1220_v41 = vand.u32 4294901760, %v1219_v19  ;;  %v3316_v18 = vand.u32 4294901760, %v2779_v32  ;;  %v1226_v19 = vand.u32 4294901760, %v1225_v59  ;;  %v814_v59 = vld [vmem:[#allocation3 + $0x1b8] sm:$0xff] }
  0x96   :  { %859 = vmatpush.msrb.mxu0 %v2713_v10  ;;  %1170 = vmatpush.msra.mxu2 %v2715_v33 }
  0x97   :  { %1055 = vmatpush.msrb.mxu3 %v2713_v10  ;;  %964 = vmatpush.msrb.mxu1 %v963_v62  ;;  %v1231_v35 = vsub.f32 %v2779_v32, %v3316_v18 }
  0x98   :  { %1066 = vmatpush.msra.mxu0 %v871_v23  ;;  %1172 = vmatpush.msra.mxu2 %v2740_v27  ;;  %v1214_v23 = vand.u32 4294901760, %v1213_v40  ;;  %v2789_v40 = vsub.f32 %v818_v28, %v2776_v29 }
  0x99   :  { %1133 = vmatpush.msra.mxu1 %v2509_v26 }
  0x9a   :  { %1070 = vmatpush.msra.mxu0 %v877_v30  ;;  %1174 = vmatpush.msra.mxu2 %v2750_v43  ;;  %v817_v30 = vld [vmem:[#allocation3 + $0x1d0] sm:$0xff]  ;;  %v3318_v62 = vand.u32 4294901760, %v2789_v40 }
  0x9b   :  { %1215 = vmatpush.msra.mxu3 %v1214_v23  ;;  %v2786_v20 = vand.u32 4294901760, %v817_v30  ;;  %v1905_v23 = vld [vmem:[%s3289_s2] ss:$0 sm:$0xff]  ;;  %1135 = vmatpush.msra.mxu1 %v2516_v51 }
  0x9c   :  { %1074 = vmatpush.msra.mxu0 %v883_v22  ;;  %1176 = vmatpush.msra.mxu2 %v2765_v24  ;;  %v816_v22 = vld [vmem:[#allocation3 + $0x1c8] sm:$0xff] }
  0x9d   :  { %1221 = vmatpush.msra.mxu3 %v1220_v41  ;;  %v2802_v28 = vand.u32 4294901760, %v816_v22  ;;  %v2805_v26 = vsub.f32 %v817_v30, %v2786_v20  ;;  %v1232_v41 = vand.u32 4294901760, %v1231_v35  ;;  %v1237_v30 = vsub.f32 %v2789_v40, %v3318_v62  ;;  %1137 = vmatpush.msra.mxu1 %v2526_v36 }
  0x9e   :  { %1078 = vmatpush.msra.mxu0 %v889_v2  ;;  %1178 = vmatpush.msra.mxu2 %v2776_v29 }
  0x9f   :  { %v1242_v18 = vand.u32 4294901760, %v2805_v26  ;;  %1227 = vmatpush.msra.mxu3 %v1226_v19  ;;  %v2822_v51 = vsub.f32 %v816_v22, %v2802_v28  ;;  %v1238_v35 = vand.u32 4294901760, %v1237_v30  ;;  %1139 = vmatpush.msra.mxu1 %v2578_v60  ;;  %v2835_v22 = vsub.f32 %v815_v4, %v2818_v6  ;;  %v813_v19 = vld [vmem:[#allocation3 + $0x1b0] sm:$0xff] }
  0xa0   :  { %1082 = vmatpush.msra.mxu0 %v895_v17  ;;  %1180 = vmatpush.msra.mxu2 %v2786_v20  ;;  %v2830_v17 = vand.u32 4294901760, %v814_v59 }
  0xa1   :  { %v1243_v47 = vsub.f32 %v2805_v26, %v1242_v18  ;;  %1233 = vmatpush.msra.mxu3 %v1232_v41  ;;  %v3319_v36 = vand.u32 4294901760, %v2822_v51  ;;  %1141 = vmatpush.msra.mxu1 %v2598_v13  ;;  %v1254_v4 = vand.u32 4294901760, %v2835_v22 }
  0xa2   :  { %1086 = vmatpush.msra.mxu0 %v901_v25  ;;  %1182 = vmatpush.msra.mxu2 %v2802_v28  ;;  %v2840_v25 = vand.u32 4294901760, %v813_v19 }
  0xa3   :  { %v1244_v58 = vand.u32 4294901760, %v1243_v47  ;;  %1239 = vmatpush.msra.mxu3 %v1238_v35  ;;  %v1249_v60 = vsub.f32 %v2822_v51, %v3319_v36  ;;  %1143 = vmatpush.msra.mxu1 %v2609_v16  ;;  %v1255_v35 = vsub.f32 %v2835_v22, %v1254_v4  ;;  %v811_v47 = vld [vmem:[#allocation3 + $0x1a0] sm:$0xff] }
  0xa4   :  { %1090 = vmatpush.msra.mxu0 %v907_v7  ;;  %1184 = vmatpush.msra.mxu2 %v2818_v6  ;;  %v2857_v41 = vsub.f32 %v813_v19, %v2840_v25  ;;  %v2870_v16 = vand.u32 4294901760, %v811_v47 }
  0xa5   :  { %1245 = vmatpush.msra.mxu3 %v1244_v58  ;;  %1145 = vmatpush.msra.mxu1 %v2616_v9 }
  0xa6   :  { %1094 = vmatpush.msra.mxu0 %v913_v44  ;;  %1186 = vmatpush.msra.mxu2 %v2830_v17  ;;  %v1266_v44 = vand.u32 4294901760, %v2857_v41  ;;  %v2885_v9 = vsub.f32 %v811_v47, %v2870_v16 }
  0xa7   :  { %1147 = vmatpush.msra.mxu1 %v2628_v14 }
  0xa8   :  { %1098 = vmatpush.msra.mxu0 %v919_v42  ;;  %1188 = vmatpush.msra.mxu2 %v2840_v25  ;;  %v1267_v42 = vsub.f32 %v2857_v41, %v1266_v44 }
  0xa9   :  { %1149 = vmatpush.msra.mxu1 %v2640_v39 }
  0xaa   :  { %1102 = vmatpush.msra.mxu0 %v925_v8  ;;  %v1268_v55 = vand.u32 4294901760, %v1267_v42  ;;  %v3320_v8 = vand.u32 4294901760, %v2885_v9 }
  0xab   :  { %1151 = vmatpush.msra.mxu1 %v2648_v49 }
  0xac   :  { %1106 = vmatpush.msra.mxu0 %v931_v12  ;;  %v1279_v31 = vsub.f32 %v2885_v9, %v3320_v8 }
  0xad   :  { %1153 = vmatpush.msra.mxu1 %v2661_v21 }
  0xae   :  { %1110 = vmatpush.msra.mxu0 %v937_v61  ;;  %v1280_v48 = vand.u32 4294901760, %v1279_v31 }
  0xaf   :  { %1155 = vmatpush.msra.mxu1 %v2671_v54  ;;  %v3357_v54 = vand.u32 4294901760, %v2728_v53 }
  0xb0   :  { %1114 = vmatpush.msra.mxu0 %v943_v5 }
  0xb1   :  { %1157 = vmatpush.msra.mxu1 %v2686_v45 }
  0xb2   :  { %1118 = vmatpush.msra.mxu0 %v949_v50 }
  0xb3   :  { %1159 = vmatpush.msra.mxu1 %v2699_v34  ;;  %v1897_v34 = vld [vmem:[%s3290_s3 + $0x8] sm:$0xff] }
  0xb4   :  { %1122 = vmatpush.msra.mxu0 %v955_v38 }
  0xb5   :  { %1161 = vmatpush.msra.mxu1 %v2707_v0  ;;  %v2959_v0 = vand.u32 4294901760, %v1897_v34 }
  0xb6   :  { %1126 = vmatpush.msra.mxu0 %v3357_v54 }
  0xb7   :  { %1163 = vmatpush.msra.mxu1 %v2713_v10  ;;  %v2962_v10 = vsub.f32 %v1897_v34, %v2959_v0  ;;  %v1519_v34 = vld [vmem:[#allocation6 + $0x30] sm:$0xff] }
  0xb9   :  { %v1203_v54 = vand.u32 4294901760, %v2962_v10 }
  0xc7   :  { %v138_v2 = vpop.f32.mrf.mxu0 }
  0xc8   :  { %v139_v62 = vadd.f32 %v1905_v23, %v138_v2  ;;  %v2843_v23 = vsub.f32 %v814_v59, %v2830_v17  ;;  %v812_v2 = vld [vmem:[#allocation3 + $0x1a8] sm:$0xff]  ;;  %v1250_v59 = vand.u32 4294901760, %v1249_v60 }
  0xc9   :  { %v2854_v7 = vand.u32 4294901760, %v812_v2 }
  0xca   :  { %v1260_v1 = vand.u32 4294901760, %v2843_v23  ;;  %1251 = vmatpush.msra.mxu3 %v1250_v59  ;;  %v809_v59 = vld [vmem:[#allocation3 + $0x190] sm:$0xff] }
  0xcb   :  { %v2874_v19 = vsub.f32 %v812_v2, %v2854_v7  ;;  %1190 = vmatpush.msra.mxu2 %v2854_v7 }
  0xcc   :  { %v1261_v3 = vsub.f32 %v2843_v23, %v1260_v1 }
  0xcd   :  { %v1272_v2 = vand.u32 4294901760, %v2874_v19  ;;  %1192 = vmatpush.msra.mxu2 %v2870_v16 }
  0xce   :  { %v1262_v52 = vand.u32 4294901760, %v1261_v3  ;;  %v2893_v3 = vand.u32 4294901760, %v809_v59 }
  0xcf   :  { %v1273_v14 = vsub.f32 %v2874_v19, %v1272_v2 }
  0xd0   :  { %v2912_v39 = vsub.f32 %v809_v59, %v2893_v3 }
  0xd2   :  { %v1290_v59 = vand.u32 4294901760, %v2912_v39 }
  0xd4   :  { %v239_v30 = vpop.f32.mrf.mxu1  ;;  %v1291_v15 = vsub.f32 %v2912_v39, %v1290_v59 }
  0xd5   :  { %v240_v13 = vadd.f32 %v239_v30, %v139_v62  ;;  %v293_v36 = vpop.f32.mrf.mxu2  ;;  %v1256_v62 = vand.u32 4294901760, %v1255_v35  ;;  %v810_v30 = vld [vmem:[#allocation3 + $0x198] sm:$0xff]  ;;  %v332_v35 = vpop.f32.mrf.mxu3 }
  0xd6   :  { %v2882_v58 = vand.u32 4294901760, %v810_v30 }
  0xd7   :  { %v294_v60 = vadd.f32 %v293_v36, %v240_v13  ;;  %1257 = vmatpush.msra.mxu3 %v1256_v62  ;;  %v808_v36 = vld [vmem:[#allocation3 + $0x188] sm:$0xff] }
  0xd8   :  { %v2896_v47 = vsub.f32 %v810_v30, %v2882_v58  ;;  %v2909_v13 = vand.u32 4294901760, %v808_v36  ;;  %v1274_v30 = vand.u32 4294901760, %v1273_v14  ;;  %1194 = vmatpush.msra.mxu2 %v2882_v58  ;;  %v1292_v14 = vand.u32 4294901760, %v1291_v15 }
  0xd9   :  { %1263 = vmatpush.msra.mxu3 %v1262_v52  ;;  %v333_v62 = vadd.f32 %v332_v35, %v294_v60  ;;  %v807_v52 = vld [vmem:[#allocation3 + $0x180] sm:$0xff] }
  0xda   :  { %v1284_v12 = vand.u32 4294901760, %v2896_v47  ;;  %v401_v42 = vpop.f32.mrf.mxu0  ;;  %v2922_v8 = vand.u32 4294901760, %v807_v52  ;;  %v2926_v49 = vsub.f32 %v808_v36, %v2909_v13  ;;  %1196 = vmatpush.msra.mxu2 %v2893_v3 }
  0xdb   :  { %1269 = vmatpush.msra.mxu3 %v1268_v55  ;;  %v402_v35 = vadd.f32 %v401_v42, %v333_v62 }
  0xdc   :  { %v1285_v61 = vsub.f32 %v2896_v47, %v1284_v12  ;;  %v2935_v5 = vsub.f32 %v807_v52, %v2922_v8  ;;  %v1296_v21 = vand.u32 4294901760, %v2926_v49  ;;  %1198 = vmatpush.msra.mxu2 %v2909_v13 }
  0xdd   :  { %1275 = vmatpush.msra.mxu3 %v1274_v30  ;;  %v438_v55 = vpop.f32.mrf.mxu1 }
  0xde   :  { %v1286_v60 = vand.u32 4294901760, %v1285_v61  ;;  %v1302_v46 = vand.u32 4294901760, %v2935_v5  ;;  %v1297_v50 = vsub.f32 %v2926_v49, %v1296_v21  ;;  %1200 = vmatpush.msra.mxu2 %v2922_v8  ;;  %v439_v11 = vadd.f32 %v438_v55, %v402_v35  ;;  %v479_v45 = vpop.f32.mrf.mxu2 }
  0xdf   :  { %1281 = vmatpush.msra.mxu3 %v1280_v48 }
  0xe0   :  { %v1303_v36 = vsub.f32 %v2935_v5, %v1302_v46  ;;  %v1298_v38 = vand.u32 4294901760, %v1297_v50  ;;  %v480_v62 = vadd.f32 %v479_v45, %v439_v11  ;;  %v3358_v45 = vand.u32 4294901760, %v2731_v63 }
  0xe1   :  { %1287 = vmatpush.msra.mxu3 %v1286_v60  ;;  %v580_v53 = vpop.f32.mrf.mxu3 }
  0xe2   :  { %v1304_v31 = vand.u32 4294901760, %v1303_v36  ;;  %v581_v52 = vadd.f32 %v580_v53, %v480_v62 }
  0xe3   :  { %1293 = vmatpush.msra.mxu3 %v1292_v14 }
  0xe5   :  { %1299 = vmatpush.msra.mxu3 %v1298_v38  ;;  %v1204_v38 = vsub.f32 %v2962_v10, %v1203_v54 }
  0xe7   :  { %1305 = vmatpush.msra.mxu3 %v1304_v31  ;;  %v1205_v53 = vand.u32 4294901760, %v1204_v38 }
  0xee   :  { %v634_v30 = vpop.f32.mrf.mxu0 }
  0xef   :  { %v635_v42 = vadd.f32 %v634_v30, %v581_v52  ;;  %v3359_v30 = vand.u32 4294901760, %v2771_v57  ;;  %v3360_v52 = vand.u32 4294901760, %v2779_v32 }
  0xf5   :  { %v673_v48 = vpop.f32.mrf.mxu1 }
  0xf6   :  { %v674_v61 = vadd.f32 %v673_v48, %v635_v42 }
  0xf8   :  { %v742_v60 = vpop.f32.mrf.mxu2 }
  0xf9   :  { %v743_v15 = vadd.f32 %v742_v60, %v674_v61 }
  0xfa   :  { %v779_v35 = vpop.f32.mrf.mxu3 }
  0xfb   :  { %v780_v55 = vadd.f32 %v779_v35, %v743_v15 }
  0xfd   :  { %1908 = vtanh.f32 %v780_v55 }
 0x103   :  { %v1909_v14 = vpop.eup %1908 }
 0x104   :  { %783 = vst [vmem:[%s3294_s7] sm:$0xff] %v1909_v14  ;;  %v860_v50 = vand.u32 4294901760, %v1909_v14 }
 0x106   :  { %966 = vmatmul.f32.vlgmr.msrb.gmra.mxu1 %v860_v50  ;;  %v861_v36 = vsub.f32 %v1909_v14, %v860_v50  ;;  %v3154_v14 = vand.u32 4294901760, %v1519_v34 }
 0x107   :  { %1366 = vmatpush.msrb.mxu1 %v2715_v33 }
 0x108   :  { %1020 = vmatmul.f32.vlgmr.msrb.gmra.mxu2 %v861_v36  ;;  %v862_v11 = vand.u32 4294901760, %v861_v36 }
 0x109   :  { %1407 = vmatpush.msrb.mxu2 %v3358_v45  ;;  %1368 = vmatpush.msrb.mxu1 %v2740_v27  ;;  %v3166_v45 = vsub.f32 %v1519_v34, %v3154_v14 }
 0x10a   :  { %1059 = vmatmul.f32.vlgmr.msrb.gmra.mxu3 %v862_v11  ;;  %v863_v31 = vsub.f32 %v861_v36, %v862_v11 }
 0x10b   :  { %1411 = vmatpush.msrb.mxu2 %v1218_v56  ;;  %1474 = vmatpush.msrb.mxu3 %v2715_v33  ;;  %v3361_v33 = vand.u32 4294901760, %v2789_v40 }
 0x10c   :  { %v864_v62 = vand.u32 4294901760, %v863_v31  ;;  %1370 = vmatpush.msrb.mxu1 %v2750_v43  ;;  %v1517_v31 = vld [vmem:[#allocation6 + $0x20] sm:$0xff] }
 0x10d   :  { %1415 = vmatpush.msrb.mxu2 %v3359_v30  ;;  %1476 = vmatpush.msrb.mxu3 %v2740_v27  ;;  %v3363_v27 = vand.u32 4294901760, %v2885_v9 }
 0x10e   :  { %865 = vmatmul.f32.vlgmr.msrb.gmra.mxu0 %v864_v62  ;;  %1165 = vmatmul.f32.vlgmr.msra.gmra.mxu1 %v860_v50 }
 0x10f   :  { %1313 = vmatpush.msrb.mxu0 %v2731_v63  ;;  %1419 = vmatpush.msrb.mxu2 %v3360_v52  ;;  %v3362_v63 = vand.u32 4294901760, %v2822_v51  ;;  %v3175_v52 = vand.u32 4294901760, %v1517_v31 }
 0x110   :  { %1478 = vmatpush.msrb.mxu3 %v2750_v43  ;;  %1206 = vmatmul.f32.vlgmr.msra.gmra.mxu2 %v1205_v53  ;;  %v1527_v43 = vld [vmem:[#allocation6 + $0x70] sm:$0xff] }
 0x111   :  { %1316 = vmatpush.msrb.mxu0 %v2753_v37  ;;  %1423 = vmatpush.msrb.mxu2 %v3361_v33  ;;  %v3062_v56 = vand.u32 4294901760, %v1527_v43  ;;  %v1630_v33 = vand.u32 4294901760, %v3166_v45 }
 0x112   :  { %1480 = vmatpush.msrb.mxu3 %v2765_v24  ;;  %1372 = vmatpush.msrb.mxu1 %v2765_v24  ;;  %v1526_v24 = vld [vmem:[#allocation6 + $0x68] sm:$0xff] }
 0x113   :  { %1319 = vmatpush.msrb.mxu0 %v2771_v57  ;;  %1307 = vmatmul.f32.vlgmr.msra.gmra.mxu3 %v2959_v0 }
 0x114   :  { %1427 = vmatpush.msrb.mxu2 %v1242_v18  ;;  %1482 = vmatpush.msrb.mxu3 %v2776_v29  ;;  %v3070_v18 = vand.u32 4294901760, %v1526_v24 }
 0x115   :  { %1322 = vmatpush.msrb.mxu0 %v2779_v32  ;;  %1374 = vmatpush.msrb.mxu1 %v2776_v29  ;;  %v1528_v32 = vld [vmem:[#allocation6 + $0x78] sm:$0xff] }
 0x116   :  { %1128 = vmatmul.f32.vlgmr.msra.gmra.mxu0 %v860_v50  ;;  %1431 = vmatpush.msrb.mxu2 %v3362_v63  ;;  %v3057_v29 = vand.u32 4294901760, %v1528_v32  ;;  %v1518_v50 = vld [vmem:[#allocation6 + $0x28] sm:$0xff]  ;;  %v1516_v63 = vld [vmem:[#allocation6 + $0x18] sm:$0xff] }
 0x117   :  { %1325 = vmatpush.msrb.mxu0 %v2789_v40  ;;  %1484 = vmatpush.msrb.mxu3 %v2786_v20  ;;  %v3161_v38 = vand.u32 4294901760, %v1518_v50 }
 0x118   :  { %1376 = vmatpush.msrb.mxu1 %v2786_v20  ;;  %1435 = vmatpush.msrb.mxu2 %v1254_v4  ;;  %v3060_v37 = vsub.f32 %v1528_v32, %v3057_v29  ;;  %v1525_v20 = vld [vmem:[#allocation6 + $0x60] sm:$0xff] }
 0x119   :  { %1328 = vmatpush.msrb.mxu0 %v2805_v26  ;;  %1486 = vmatpush.msrb.mxu3 %v2802_v28  ;;  %v3080_v26 = vsub.f32 %v1526_v24, %v3070_v18  ;;  %v3173_v30 = vsub.f32 %v1518_v50, %v3161_v38  ;;  %v3185_v24 = vand.u32 4294901760, %v1516_v63 }
 0x11a   :  { %1378 = vmatpush.msrb.mxu1 %v2802_v28  ;;  %1439 = vmatpush.msrb.mxu2 %v1260_v1  ;;  %v1576_v57 = vand.u32 4294901760, %v3060_v37 }
 0x11b   :  { %1331 = vmatpush.msrb.mxu0 %v2822_v51  ;;  %1488 = vmatpush.msrb.mxu3 %v2818_v6  ;;  %v3082_v51 = vand.u32 4294901760, %v1525_v20  ;;  %v1636_v32 = vand.u32 4294901760, %v3173_v30 }
 0x11c   :  { %1380 = vmatpush.msrb.mxu1 %v2818_v6  ;;  %1443 = vmatpush.msrb.mxu2 %v1266_v44  ;;  %v3068_v6 = vsub.f32 %v1527_v43, %v3062_v56  ;;  %v1577_v40 = vsub.f32 %v3060_v37, %v1576_v57  ;;  %v3183_v43 = vsub.f32 %v1517_v31, %v3175_v52 }
 0x11d   :  { %1334 = vmatpush.msrb.mxu0 %v2835_v22  ;;  %1490 = vmatpush.msrb.mxu3 %v2830_v17  ;;  %v3092_v4 = vsub.f32 %v1525_v20, %v3082_v51  ;;  %v1631_v20 = vsub.f32 %v3166_v45, %v1630_v33 }
 0x11e   :  { %1382 = vmatpush.msrb.mxu1 %v2830_v17  ;;  %1447 = vmatpush.msrb.mxu2 %v1272_v2  ;;  %v1582_v28 = vand.u32 4294901760, %v3068_v6  ;;  %v1524_v17 = vld [vmem:[#allocation6 + $0x58] sm:$0xff]  ;;  %v1578_v22 = vand.u32 4294901760, %v1577_v40  ;;  %v1515_v40 = vld [vmem:[#allocation6 + $0x10] sm:$0xff] }
 0x11f   :  { %1337 = vmatpush.msrb.mxu0 %v2843_v23  ;;  %1492 = vmatpush.msrb.mxu3 %v2840_v25  ;;  %v1588_v23 = vand.u32 4294901760, %v3080_v26  ;;  %v3096_v1 = vand.u32 4294901760, %v1524_v17 }
 0x120   :  { %1384 = vmatpush.msrb.mxu1 %v2840_v25  ;;  %1451 = vmatpush.msrb.mxu2 %v3363_v27  ;;  %v1583_v25 = vsub.f32 %v3068_v6, %v1582_v28 }
 0x121   :  { %1340 = vmatpush.msrb.mxu0 %v2857_v41  ;;  %1494 = vmatpush.msrb.mxu3 %v2854_v7  ;;  %v1589_v44 = vsub.f32 %v3080_v26, %v1588_v23 }
 0x122   :  { %1386 = vmatpush.msrb.mxu1 %v2854_v7  ;;  %1455 = vmatpush.msrb.mxu2 %v1284_v12  ;;  %v1523_v7 = vld [vmem:[#allocation6 + $0x50] sm:$0xff]  ;;  %v1584_v41 = vand.u32 4294901760, %v1583_v25  ;;  %v3198_v25 = vsub.f32 %v1516_v63, %v3185_v24 }
 0x123   :  { %1343 = vmatpush.msrb.mxu0 %v2874_v19  ;;  %1496 = vmatpush.msrb.mxu3 %v2870_v16  ;;  %v3103_v19 = vand.u32 4294901760, %v1523_v7  ;;  %v1590_v2 = vand.u32 4294901760, %v1589_v44  ;;  %v1514_v44 = vld [vmem:[#allocation6 + $0x8] sm:$0xff] }
 0x124   :  { %1388 = vmatpush.msrb.mxu1 %v2870_v16  ;;  %1459 = vmatpush.msrb.mxu2 %v1290_v59  ;;  %v1594_v16 = vand.u32 4294901760, %v3092_v4 }
 0x125   :  { %1346 = vmatpush.msrb.mxu0 %v2885_v9  ;;  %1498 = vmatpush.msrb.mxu3 %v2882_v58  ;;  %v1522_v9 = vld [vmem:[#allocation6 + $0x48] sm:$0xff] }
 0x126   :  { %1390 = vmatpush.msrb.mxu1 %v2882_v58  ;;  %1463 = vmatpush.msrb.mxu2 %v1296_v21  ;;  %v3107_v58 = vsub.f32 %v1524_v17, %v3096_v1  ;;  %v1637_v17 = vsub.f32 %v3173_v30, %v1636_v32 }
 0x127   :  { %1349 = vmatpush.msrb.mxu0 %v2896_v47  ;;  %1500 = vmatpush.msrb.mxu3 %v2893_v3  ;;  %v3117_v47 = vand.u32 4294901760, %v1522_v9 }
 0x128   :  { %1392 = vmatpush.msrb.mxu1 %v2893_v3  ;;  %1467 = vmatpush.msrb.mxu2 %v1302_v46  ;;  %v3115_v3 = vsub.f32 %v1523_v7, %v3103_v19  ;;  %v1600_v12 = vand.u32 4294901760, %v3107_v58  ;;  %v1520_v46 = vld [vmem:[#allocation6 + $0x38] sm:$0xff]  ;;  %v3200_v7 = vand.u32 4294901760, %v1515_v40 }
 0x129   :  { %1352 = vmatpush.msrb.mxu0 %v2912_v39  ;;  %1502 = vmatpush.msrb.mxu3 %v2909_v13  ;;  %v3141_v60 = vand.u32 4294901760, %v1520_v46 }
 0x12a   :  { %1469 = vmatmul.f32.vlgmr.msrb.gmra.mxu2 %v2959_v0  ;;  %1394 = vmatpush.msrb.mxu1 %v2909_v13  ;;  %v1521_v13 = vld [vmem:[#allocation6 + $0x40] sm:$0xff]  ;;  %v1606_v59 = vand.u32 4294901760, %v3115_v3  ;;  %v1601_v21 = vsub.f32 %v3107_v58, %v1600_v12 }
 0x12b   :  { %1355 = vmatpush.msrb.mxu0 %v2926_v49  ;;  %1504 = vmatpush.msrb.mxu3 %v2922_v8  ;;  %v3124_v49 = vsub.f32 %v1522_v9, %v3117_v47  ;;  %v1638_v9 = vand.u32 4294901760, %v1637_v17 }
 0x12c   :  { %1506 = vmatmul.f32.vlgmr.msrb.gmra.mxu3 %v2959_v0  ;;  %1396 = vmatpush.msrb.mxu1 %v2922_v8  ;;  %v1595_v8 = vsub.f32 %v3092_v4, %v1594_v16  ;;  %v1607_v42 = vsub.f32 %v3115_v3, %v1606_v59  ;;  %v1602_v15 = vand.u32 4294901760, %v1601_v21  ;;  %v1513_v21 = vld [vmem:[#allocation6] sm:$0xff] }
 0x12d   :  { %1358 = vmatpush.msrb.mxu0 %v2935_v5  ;;  %1400 = vmatmul.f32.vlgmr.msrb.gmra.mxu1 %v1203_v54  ;;  %v3126_v5 = vand.u32 4294901760, %v1521_v13  ;;  %v1612_v48 = vand.u32 4294901760, %v3124_v49  ;;  %v3221_v34 = vand.u32 4294901760, %v1513_v21 }
 0x12e   :  { %1361 = vmatmul.f32.vlgmr.msrb.gmra.mxu0 %v2962_v10  ;;  %1730 = vmatpush.msra.mxu3 %v3057_v29  ;;  %v1596_v39 = vand.u32 4294901760, %v1595_v8  ;;  %v1608_v35 = vand.u32 4294901760, %v1607_v42  ;;  %v3151_v10 = vsub.f32 %v1520_v46, %v3141_v60  ;;  %v1648_v8 = vand.u32 4294901760, %v3198_v25 }
 0x12f   :  { %1534 = vmatpush.msra.mxu0 %v3057_v29  ;;  %1677 = vmatpush.msra.mxu2 %v3060_v37  ;;  %v3139_v61 = vsub.f32 %v1521_v13, %v3126_v5  ;;  %v1613_v55 = vsub.f32 %v3124_v49, %v1612_v48  ;;  %v3210_v13 = vsub.f32 %v1515_v40, %v3200_v7  ;;  %v1906_v37 = vld [vmem:[%s3289_s2 + $0x1] ss:$0 sm:$0xff] }
 0x130   :  { %1732 = vmatpush.msra.mxu3 %v3062_v56  ;;  %1579 = vmatpush.msra.mxu1 %v1578_v22  ;;  %v1624_v11 = vand.u32 4294901760, %v3151_v10  ;;  %v1642_v22 = vand.u32 4294901760, %v3183_v43  ;;  %v1649_v42 = vsub.f32 %v3198_v25, %v1648_v8 }
 0x131   :  { %1536 = vmatpush.msra.mxu0 %v3062_v56  ;;  %1680 = vmatpush.msra.mxu2 %v3068_v6  ;;  %v1618_v0 = vand.u32 4294901760, %v3139_v61  ;;  %v1614_v54 = vand.u32 4294901760, %v1613_v55 }
 0x132   :  { %1734 = vmatpush.msra.mxu3 %v3070_v18  ;;  %1585 = vmatpush.msra.mxu1 %v1584_v41  ;;  %v1625_v53 = vsub.f32 %v3151_v10, %v1624_v11  ;;  %v1632_v41 = vand.u32 4294901760, %v1631_v20  ;;  %v1650_v55 = vand.u32 4294901760, %v1649_v42 }
 0x133   :  { %1538 = vmatpush.msra.mxu0 %v3070_v18  ;;  %1683 = vmatpush.msra.mxu2 %v3080_v26  ;;  %v1619_v36 = vsub.f32 %v3139_v61, %v1618_v0 }
 0x134   :  { %1736 = vmatpush.msra.mxu3 %v3082_v51  ;;  %1591 = vmatpush.msra.mxu1 %v1590_v2  ;;  %v1626_v27 = vand.u32 4294901760, %v1625_v53  ;;  %v1643_v2 = vsub.f32 %v3183_v43, %v1642_v22 }
 0x135   :  { %1540 = vmatpush.msra.mxu0 %v3082_v51  ;;  %1686 = vmatpush.msra.mxu2 %v3092_v4  ;;  %v1620_v62 = vand.u32 4294901760, %v1619_v36 }
 0x136   :  { %1738 = vmatpush.msra.mxu3 %v3096_v1  ;;  %1597 = vmatpush.msra.mxu1 %v1596_v39  ;;  %v3214_v39 = vand.u32 4294901760, %v1514_v44  ;;  %v1644_v46 = vand.u32 4294901760, %v1643_v2 }
 0x137   :  { %1542 = vmatpush.msra.mxu0 %v3096_v1  ;;  %1689 = vmatpush.msra.mxu2 %v3107_v58 }
 0x138   :  { %1740 = vmatpush.msra.mxu3 %v3103_v19  ;;  %1603 = vmatpush.msra.mxu1 %v1602_v15  ;;  %v1654_v15 = vand.u32 4294901760, %v3210_v13 }
 0x139   :  { %1544 = vmatpush.msra.mxu0 %v3103_v19  ;;  %1692 = vmatpush.msra.mxu2 %v3115_v3 }
 0x13a   :  { %1742 = vmatpush.msra.mxu3 %v3117_v47  ;;  %1609 = vmatpush.msra.mxu1 %v1608_v35  ;;  %v1659_v35 = vsub.f32 %v1514_v44, %v3214_v39  ;;  %v1655_v50 = vsub.f32 %v3210_v13, %v1654_v15 }
 0x13b   :  { %1546 = vmatpush.msra.mxu0 %v3117_v47  ;;  %1695 = vmatpush.msra.mxu2 %v3124_v49 }
 0x13c   :  { %1744 = vmatpush.msra.mxu3 %v3126_v5  ;;  %1615 = vmatpush.msra.mxu1 %v1614_v54  ;;  %v1665_v54 = vsub.f32 %v1513_v21, %v3221_v34  ;;  %v1660_v36 = vand.u32 4294901760, %v1659_v35  ;;  %v1656_v31 = vand.u32 4294901760, %v1655_v50 }
 0x13d   :  { %1548 = vmatpush.msra.mxu0 %v3126_v5  ;;  %1698 = vmatpush.msra.mxu2 %v3139_v61 }
 0x13e   :  { %1746 = vmatpush.msra.mxu3 %v3141_v60  ;;  %1621 = vmatpush.msra.mxu1 %v1620_v62  ;;  %v1666_v62 = vand.u32 4294901760, %v1665_v54  ;;  %v1661_v53 = vsub.f32 %v1659_v35, %v1660_v36 }
 0x13f   :  { %1550 = vmatpush.msra.mxu0 %v3141_v60  ;;  %1701 = vmatpush.msra.mxu2 %v3151_v10 }
 0x140   :  { %1748 = vmatpush.msra.mxu3 %v3154_v14  ;;  %1627 = vmatpush.msra.mxu1 %v1626_v27  ;;  %v1667_v63 = vsub.f32 %v1665_v54, %v1666_v62  ;;  %v1662_v27 = vand.u32 4294901760, %v1661_v53 }
 0x141   :  { %1552 = vmatpush.msra.mxu0 %v3154_v14  ;;  %1704 = vmatpush.msra.mxu2 %v3166_v45 }
 0x142   :  { %1750 = vmatpush.msra.mxu3 %v3161_v38  ;;  %1633 = vmatpush.msra.mxu1 %v1632_v41  ;;  %v1668_v20 = vand.u32 4294901760, %v1667_v63 }
 0x143   :  { %1554 = vmatpush.msra.mxu0 %v3161_v38  ;;  %1707 = vmatpush.msra.mxu2 %v3173_v30 }
 0x144   :  { %1752 = vmatpush.msra.mxu3 %v3175_v52  ;;  %1639 = vmatpush.msra.mxu1 %v1638_v9 }
 0x145   :  { %1556 = vmatpush.msra.mxu0 %v3175_v52  ;;  %1710 = vmatpush.msra.mxu2 %v3183_v43 }
 0x146   :  { %1754 = vmatpush.msra.mxu3 %v3185_v24  ;;  %1645 = vmatpush.msra.mxu1 %v1644_v46 }
 0x147   :  { %1558 = vmatpush.msra.mxu0 %v3185_v24  ;;  %1713 = vmatpush.msra.mxu2 %v3198_v25 }
 0x148   :  { %1756 = vmatpush.msra.mxu3 %v3200_v7  ;;  %1651 = vmatpush.msra.mxu1 %v1650_v55 }
 0x149   :  { %1560 = vmatpush.msra.mxu0 %v3200_v7  ;;  %1716 = vmatpush.msra.mxu2 %v3210_v13 }
 0x14a   :  { %1758 = vmatpush.msra.mxu3 %v3214_v39  ;;  %1657 = vmatpush.msra.mxu1 %v1656_v31 }
 0x14b   :  { %1562 = vmatpush.msra.mxu0 %v3214_v39  ;;  %1719 = vmatpush.msra.mxu2 %v1659_v35 }
 0x14c   :  { %1760 = vmatpush.msra.mxu3 %v3221_v34  ;;  %1663 = vmatpush.msra.mxu1 %v1662_v27 }
 0x14d   :  { %1564 = vmatpush.msra.mxu0 %v3221_v34  ;;  %1722 = vmatpush.msra.mxu2 %v1665_v54 }
 0x14e   :  { %1669 = vmatpush.msra.mxu1 %v1668_v20 }
 0x14f   :  { %1771 = vmatpush.msrb.mxu0 %v1576_v57 }
 0x150   :  { %1838 = vmatpush.msrb.mxu1 %v3057_v29 }
 0x151   :  { %1775 = vmatpush.msrb.mxu0 %v1582_v28 }
 0x152   :  { %1840 = vmatpush.msrb.mxu1 %v3062_v56 }
 0x153   :  { %1779 = vmatpush.msrb.mxu0 %v1588_v23 }
 0x154   :  { %1842 = vmatpush.msrb.mxu1 %v3070_v18 }
 0x155   :  { %1783 = vmatpush.msrb.mxu0 %v1594_v16 }
 0x156   :  { %1844 = vmatpush.msrb.mxu1 %v3082_v51 }
 0x157   :  { %1787 = vmatpush.msrb.mxu0 %v1600_v12 }
 0x158   :  { %1846 = vmatpush.msrb.mxu1 %v3096_v1 }
 0x159   :  { %1791 = vmatpush.msrb.mxu0 %v1606_v59 }
 0x15a   :  { %1848 = vmatpush.msrb.mxu1 %v3103_v19 }
 0x15b   :  { %1795 = vmatpush.msrb.mxu0 %v1612_v48 }
 0x15c   :  { %1850 = vmatpush.msrb.mxu1 %v3117_v47 }
 0x15d   :  { %1799 = vmatpush.msrb.mxu0 %v1618_v0 }
 0x15e   :  { %1852 = vmatpush.msrb.mxu1 %v3126_v5 }
 0x15f   :  { %1803 = vmatpush.msrb.mxu0 %v1624_v11 }
 0x160   :  { %1854 = vmatpush.msrb.mxu1 %v3141_v60 }
 0x161   :  { %1807 = vmatpush.msrb.mxu0 %v1630_v33 }
 0x162   :  { %1856 = vmatpush.msrb.mxu1 %v3154_v14 }
 0x163   :  { %1811 = vmatpush.msrb.mxu0 %v1636_v32 }
 0x164   :  { %1858 = vmatpush.msrb.mxu1 %v3161_v38 }
 0x165   :  { %1815 = vmatpush.msrb.mxu0 %v1642_v22 }
 0x166   :  { %1860 = vmatpush.msrb.mxu1 %v3175_v52  ;;  %v1907_v52 = vld [vmem:[%s3292_s5] ss:$0 sm:$0xff] }
 0x167   :  { %1819 = vmatpush.msrb.mxu0 %v1648_v8 }
 0x168   :  { %1862 = vmatpush.msrb.mxu1 %v3185_v24 }
 0x169   :  { %1823 = vmatpush.msrb.mxu0 %v1654_v15 }
 0x16a   :  { %1864 = vmatpush.msrb.mxu1 %v3200_v7 }
 0x16b   :  { %1827 = vmatpush.msrb.mxu0 %v1660_v36 }
 0x16c   :  { %1866 = vmatpush.msrb.mxu1 %v3214_v39 }
 0x16d   :  { %1831 = vmatpush.msrb.mxu0 %v1666_v62 }
 0x16e   :  { %1868 = vmatpush.msrb.mxu1 %v3221_v34 }
 0x183   :  { %v967_v56 = vpop.f32.mrf.mxu1 }
 0x18b   :  { %v866_v57 = vpop.f32.mrf.mxu0  ;;  %v1021_v18 = vpop.f32.mrf.mxu2 }
 0x18c   :  { %v867_v29 = vadd.f32 %v1906_v37, %v866_v57  ;;  %v1166_v1 = vpop.f32.mrf.mxu1 }
 0x18d   :  { %v1060_v26 = vpop.f32.mrf.mxu3 }
 0x18e   :  { %v968_v6 = vadd.f32 %v967_v56, %v867_v29 }
 0x190   :  { %v1022_v28 = vadd.f32 %v1021_v18, %v968_v6 }
 0x192   :  { %v1061_v51 = vadd.f32 %v1060_v26, %v1022_v28 }
 0x193   :  { %v1129_v23 = vpop.f32.mrf.mxu0  ;;  %v1207_v19 = vpop.f32.mrf.mxu2 }
 0x194   :  { %v1130_v4 = vadd.f32 %v1129_v23, %v1061_v51 }
 0x196   :  { %v1167_v16 = vadd.f32 %v1166_v1, %v1130_v4  ;;  %v1308_v3 = vpop.f32.mrf.mxu3 }
 0x198   :  { %v1208_v58 = vadd.f32 %v1207_v19, %v1167_v16 }
 0x19a   :  { %v1309_v47 = vadd.f32 %v1308_v3, %v1208_v58 }
 0x1aa   :  { %v1401_v59 = vpop.f32.mrf.mxu1 }
 0x1ab   :  { %v1362_v12 = vpop.f32.mrf.mxu0 }
 0x1ac   :  { %v1363_v49 = vadd.f32 %v1362_v12, %v1309_v47 }
 0x1ad   :  { %v1470_v5 = vpop.f32.mrf.mxu2 }
 0x1ae   :  { %v1402_v48 = vadd.f32 %v1401_v59, %v1363_v49 }
 0x1af   :  { %v1507_v61 = vpop.f32.mrf.mxu3 }
 0x1b0   :  { %v1471_v60 = vadd.f32 %v1470_v5, %v1402_v48 }
 0x1b2   :  { %v1508_v0 = vadd.f32 %v1507_v61, %v1471_v60 }
 0x1b4   :  { %1910 = vtanh.f32 %v1508_v0 }
 0x1ba   :  { %v1911_v10 = vpop.eup %1910 }
 0x1bb   :  { %1899 = vst [vmem:[%s3294_s7 + $0x8] sm:$0xff] %v1911_v10  ;;  %v1565_v14 = vand.u32 4294901760, %v1911_v10  ;;  %s1994_s7 = smov [#allocation8]  }
 0x1bc   :  { %s1880_s24 = sshll.u32 %s1994_s7, 4  ;;  %s1881_s24 = int_to_ptr.vmem [resolvable:$true] %s1880_s24 }
 0x1bd   :  { %1671 = vmatmul.f32.vlgmr.msra.gmra.mxu1 %v1565_v14  ;;  %v1566_v11 = vsub.f32 %v1911_v10, %v1565_v14 }
 0x1bf   :  { %1725 = vmatmul.f32.vlgmr.msra.gmra.mxu2 %v1566_v11  ;;  %v1567_v38 = vand.u32 4294901760, %v1566_v11 }
 0x1c1   :  { %1764 = vmatmul.f32.vlgmr.msra.gmra.mxu3 %v1567_v38  ;;  %v1568_v45 = vsub.f32 %v1566_v11, %v1567_v38 }
 0x1c3   :  { %v1569_v30 = vand.u32 4294901760, %v1568_v45 }
 0x1c5   :  { %1570 = vmatmul.f32.vlgmr.msra.gmra.mxu0 %v1569_v30  ;;  %1870 = vmatmul.f32.vlgmr.msrb.gmra.mxu1 %v1565_v14 }
 0x1cd   :  { %1833 = vmatmul.f32.vlgmr.msrb.gmra.mxu0 %v1565_v14 }
 0x23a   :  { %v1672_v33 = vpop.f32.mrf.mxu1 }
 0x242   :  { %v1571_v32 = vpop.f32.mrf.mxu0  ;;  %v1726_v40 = vpop.f32.mrf.mxu2 }
 0x243   :  { %v1572_v43 = vadd.f32 %v1907_v52, %v1571_v32  ;;  %v1871_v44 = vpop.f32.mrf.mxu1 }
 0x244   :  { %v1765_v22 = vpop.f32.mrf.mxu3 }
 0x245   :  { %v1673_v24 = vadd.f32 %v1672_v33, %v1572_v43 }
 0x247   :  { %v1727_v17 = vadd.f32 %v1726_v40, %v1673_v24 }
 0x249   :  { %v1766_v25 = vadd.f32 %v1765_v22, %v1727_v17 }
 0x24a   :  { %v1834_v7 = vpop.f32.mrf.mxu0 }
 0x24b   :  { %v1835_v41 = vadd.f32 %v1834_v7, %v1766_v25 }
 0x24d   :  { %v1872_v9 = vadd.f32 %v1871_v44, %v1835_v41 }
 0x24f   :  { %1874 = vst [vmem:[#allocation8] sm:$0xff] %v1872_v9 }
 0x250   :  { %1885 = dma.vmem_to_hbm [thread:$0]  %s1881_s24, 128, %s1883_s27, [#allocation5]  }
 0x251   :  { %1988 = dma.done.wait [#allocation5], 128  }
 0x252   :  { %1989 = vsyncadd [#allocation5], 4294967168 }
 0x253   :  { %1894 = vsyncpa [#allocation4], 1 }
 0x254   :  { %1895 = vsyncpa [#allocation7], 1 }
 0x255   :  { %1896 = vsyncpa [#allocation5], 1 }

</bundles_post_ra>
